<compile_context>
chip_gen: v5e
topology: v5e:2x2
jax: 0.10.0
libtpu: 0.0.40
codegen_flags: <defaults>
</compile_context>

<pallas_src>
import functools
import math

import jax
import jax.numpy as jnp
from jax.experimental import pallas as pl
from jax.experimental.pallas import tpu as pltpu


def _round_up(x: int, m: int) -> int:
    return ((x + m - 1) // m) * m


def _posenc_kernel(off_ref, ch_ref, table_ref, dw_ref, out_ref, *,
                   max_rel: int, chunk: int):
    # off_ref  : (1, TM)    int32  relative-position offsets (tokens on lanes)
    # ch_ref   : (1, TM)    int32  same-chain indicator in {0, 1}
    # table_ref: (E, VPAD)  f32    (relpos_embed + chains_embed[0])^T, zero-padded
    # dw_ref   : (E, 1)     f32    (chains_embed[1] - chains_embed[0])^T
    # out_ref  : (TM, E)    f32    output, already in final token-major layout
    vpad = table_ref.shape[1]
    tm = out_ref.shape[0]

    table = table_ref[...]                                      # (E, VPAD), hoisted
    dw = dw_ref[...]                                            # (E, 1),   hoisted
    sub = jax.lax.broadcasted_iota(jnp.int32, (vpad, 1), 0)     # vocab slot per sublane

    # Static Python loop over lane chunks -> static slices, one-hot stays small.
    for c in range(tm // chunk):
        lo, hi = c * chunk, (c + 1) * chunk
        off = off_ref[:, lo:hi]                                 # (1, C) int32
        ch = ch_ref[:, lo:hi].astype(jnp.float32)               # (1, C)
        d = jnp.clip(off + max_rel, 0, 2 * max_rel)             # (1, C) in [0, vocab)
        onehot = (sub == d).astype(jnp.float32)                 # (VPAD, C)
        # gather(relpos, d) + chains_w0, transposed: (E, VPAD) @ (VPAD, C)
        g = jnp.dot(table, onehot,
                    precision=jax.lax.Precision.HIGHEST,
                    preferred_element_type=jnp.float32)         # (E, C)
        # chains blend: + chains * (w1 - w0).  Exact for chains in {0, 1}
        # (matches nn.Embedding(2) lookup for binary chain ids).
        g = g + ch * dw                                         # (E, C)
        # transpose to token-major and store: avoids a post-kernel XLA
        # transpose (a full extra HBM read+write of the result).
        out_ref[lo:hi, :] = g.T.astype(out_ref.dtype)


def positional_encodings_pallas(offset, chains, relpos_weight, chains_weight, *,
                                max_relative_feature: int, tm: int = 4096,
                                chunk: int = 512):
    """Pallas implementation of PositionalEncodings.forward.

    offset, chains : integer arrays of identical shape (any rank); chains in {0, 1}.
    relpos_weight  : (2*max_relative_feature + 1, num_embeddings)
    chains_weight  : (2, num_embeddings)
    returns        : (*offset.shape, num_embeddings), dtype of relpos_weight
    """
    assert offset.shape == chains.shape
    orig_shape = offset.shape
    vocab = 2 * max_relative_feature + 1
    num_embeddings = relpos_weight.shape[1]
    assert relpos_weight.shape == (vocab, num_embeddings)
    assert chains_weight.shape == (2, num_embeddings)
    out_dtype = relpos_weight.dtype

    n = math.prod(orig_shape)
    # Tile choice: large tiles amortize the ~0.35us per-grid-step overhead;
    # keep >= 2 tiles when there is enough work (v7x megacore); tile is a
    # multiple of `chunk` so the in-kernel chunk loop is exact.
    tm = max(chunk, _round_up(tm, chunk))
    n_tiles = max((n + tm - 1) // tm, 2 if n >= 2 * chunk else 1)
    tm = _round_up(-(-n // n_tiles), chunk)          # balance tiles, minimal padding
    assert (n_tiles - 1) * tm < n <= n_tiles * tm

    e_pad = _round_up(num_embeddings, 8)   # sublane-align E for the in-kernel transpose
    vpad = _round_up(vocab, 8)             # contraction dim only needs 8-alignment

    # Fold chains_embed[0] into every relpos column (the one-hot sums to 1), so
    # the kernel needs one matmul + one blend.  Keep the table transposed
    # (E on sublanes) so the MXU result is lane-dense over tokens.
    w0 = chains_weight[0].astype(jnp.float32)                          # (E,)
    dw = (chains_weight[1] - chains_weight[0]).astype(jnp.float32)     # (E,)
    table_t = jnp.zeros((e_pad, vpad), jnp.float32)
    table_t = table_t.at[:num_embeddings, :vocab].set(
        relpos_weight.astype(jnp.float32).T + w0[:, None])
    dw_col = jnp.zeros((e_pad, 1), jnp.float32).at[:num_embeddings, 0].set(dw)

    # Flat index streams, no host-side pad/stack: ragged tails are handled by
    # Pallas partial-block masking (garbage lanes never reach HBM; all math on
    # them is finite and per-token, so nothing leaks into valid rows).
    off2d = offset.reshape(1, n).astype(jnp.int32)
    ch2d = chains.reshape(1, n).astype(jnp.int32)

    kernel = functools.partial(_posenc_kernel,
                               max_rel=max_relative_feature, chunk=chunk)

    out = pl.pallas_call(
        kernel,
        out_shape=jax.ShapeDtypeStruct((n, e_pad), out_dtype),
        grid=(n_tiles,),
        in_specs=[
            pl.BlockSpec((1, tm), lambda i: (0, i)),            # offset stream
            pl.BlockSpec((1, tm), lambda i: (0, i)),            # chains stream
            pl.BlockSpec((e_pad, vpad), lambda i: (0, 0)),      # folded table^T (resident)
            pl.BlockSpec((e_pad, 1), lambda i: (0, 0)),         # (w1 - w0)^T    (resident)
        ],
        out_specs=pl.BlockSpec((tm, e_pad), lambda i: (i, 0)),
        compiler_params=pltpu.CompilerParams(
            dimension_semantics=("parallel",)),
    )(off2d, ch2d, table_t, dw_col)

    if e_pad != num_embeddings:
        out = out[:, :num_embeddings]        # rare: only when num_embeddings % 8 != 0
    return out.reshape(*orig_shape, num_embeddings)


def positional_encodings_ref(offset, chains, relpos_weight, chains_weight, *,
                             max_relative_feature: int):
    d = jnp.clip(offset + max_relative_feature, 0, 2 * max_relative_feature)
    return (jnp.take(relpos_weight, d, axis=0)
            + jnp.take(chains_weight, chains, axis=0))


if __name__ == "__main__":
    key = jax.random.PRNGKey(0)
    k_rel, k_ch, k_off, k_chain = jax.random.split(key, 4)

    # Module config (small synthetic): num_embeddings=32, max_relative_feature=32
    num_embeddings = 32
    max_relative_feature = 32
    vocab = 2 * max_relative_feature + 1

    relpos_weight = jax.random.normal(k_rel, (vocab, num_embeddings), jnp.float32)
    chains_weight = jax.random.normal(k_ch, (2, num_embeddings), jnp.float32)

    # Inputs: pairwise offsets / same-chain indicator, shape (B, L, K)
    B, L, K = 2, 16, 16
    offset = jax.random.randint(k_off, (B, L, K), -48, 48, dtype=jnp.int32)
    chains = jax.random.randint(k_chain, (B, L, K), 0, 2, dtype=jnp.int32)

    out = jax.block_until_ready(positional_encodings_pallas(
        offset, chains, relpos_weight, chains_weight,
        max_relative_feature=max_relative_feature))
    ref = positional_encodings_ref(offset, chains, relpos_weight, chains_weight,
                                   max_relative_feature=max_relative_feature)
    assert out.shape == (B, L, K, num_embeddings)
    assert jnp.allclose(out, ref, atol=1e-5, rtol=1e-5)

    # ragged token count (exercises the partial-final-block masked writeback)
    off2 = jax.random.randint(k_off, (3, 7), -48, 48, dtype=jnp.int32)
    ch2 = jax.random.randint(k_chain, (3, 7), 0, 2, dtype=jnp.int32)
    out2 = jax.block_until_ready(positional_encodings_pallas(
        off2, ch2, relpos_weight, chains_weight,
        max_relative_feature=max_relative_feature))
    ref2 = positional_encodings_ref(off2, ch2, relpos_weight, chains_weight,
                                    max_relative_feature=max_relative_feature)
    assert out2.shape == (3, 7, num_embeddings)
    assert jnp.allclose(out2, ref2, atol=1e-5, rtol=1e-5)

    # multi-tile grid (forced >=2 tiles for v7x megacore) + ragged last tile
    off3 = jax.random.randint(k_off, (2, 40, 40), -48, 48, dtype=jnp.int32)
    ch3 = jax.random.randint(k_chain, (2, 40, 40), 0, 2, dtype=jnp.int32)
    out3 = jax.block_until_ready(positional_encodings_pallas(
        off3, ch3, relpos_weight, chains_weight,
        max_relative_feature=max_relative_feature))
    ref3 = positional_encodings_ref(off3, ch3, relpos_weight, chains_weight,
                                    max_relative_feature=max_relative_feature)
    assert out3.shape == (2, 40, 40, num_embeddings)
    assert jnp.allclose(out3, ref3, atol=1e-5, rtol=1e-5)

    print("KERNEL_OK")
</pallas_src>

<mosaic_0001>
module attributes {stable_mosaic.version = 11 : i64} {
  func.func @_posenc_kernel(%arg0: i32, %arg1: memref<1x512xi32, #tpu.memory_space<vmem>>, %arg2: memref<1x512xi32, #tpu.memory_space<vmem>>, %arg3: memref<32x72xf32, #tpu.memory_space<vmem>>, %arg4: memref<32x1xf32, #tpu.memory_space<vmem>>, %arg5: memref<512x32xf32, #tpu.memory_space<vmem>>) attributes {dimension_semantics = [#tpu.dimension_semantics<parallel>], iteration_bounds = array<i64: 1>, scalar_prefetch = 0 : i64, scratch_operands = 0 : i64, tpu.core_type = #tpu.core_type<tc>, window_params = [{transform_indices = @transform_0, window_bounds = array<i64: 1, 512>}, {transform_indices = @transform_1, window_bounds = array<i64: 1, 512>}, {pipeline_mode = #tpu.pipeline_mode<synchronous>, transform_indices = @transform_2, window_bounds = array<i64: 32, 72>}, {pipeline_mode = #tpu.pipeline_mode<synchronous>, transform_indices = @transform_3, window_bounds = array<i64: 32, 1>}, {transform_indices = @transform_4, window_bounds = array<i64: 512, 32>}]} {
    %c0 = arith.constant 0 : index
    %c0_0 = arith.constant 0 : index
    %0 = vector.load %arg3[%c0, %c0_0] : memref<32x72xf32, #tpu.memory_space<vmem>>, vector<32x72xf32>
    %c0_1 = arith.constant 0 : index
    %c0_2 = arith.constant 0 : index
    %1 = vector.load %arg4[%c0_1, %c0_2] : memref<32x1xf32, #tpu.memory_space<vmem>>, vector<32x1xf32>
    %2 = tpu.iota {dimensions = array<i32: 0>} : vector<72x1xi32>
    %c0_3 = arith.constant 0 : index
    %c0_4 = arith.constant 0 : index
    %3 = vector.load %arg1[%c0_3, %c0_4] : memref<1x512xi32, #tpu.memory_space<vmem>>, vector<1x512xi32>
    %c0_5 = arith.constant 0 : index
    %c0_6 = arith.constant 0 : index
    %4 = vector.load %arg2[%c0_5, %c0_6] : memref<1x512xi32, #tpu.memory_space<vmem>>, vector<1x512xi32>
    %5 = arith.sitofp %4 : vector<1x512xi32> to vector<1x512xf32>
    %c32_i32 = arith.constant 32 : i32
    %6 = vector.broadcast %c32_i32 : i32 to vector<1x512xi32>
    %7 = arith.addi %3, %6 : vector<1x512xi32>
    %c0_i32 = arith.constant 0 : i32
    %c64_i32 = arith.constant 64 : i32
    %8 = vector.broadcast %c0_i32 : i32 to vector<1x512xi32>
    %9 = arith.maxsi %8, %7 : vector<1x512xi32>
    %10 = vector.broadcast %c64_i32 : i32 to vector<1x512xi32>
    %11 = arith.minsi %10, %9 : vector<1x512xi32>
    %12 = vector.broadcast %2 : vector<72x1xi32> to vector<72x512xi32>
    %13 = vector.broadcast %11 : vector<1x512xi32> to vector<72x512xi32>
    %14 = arith.cmpi eq, %12, %13 : vector<72x512xi32>
    %15 = arith.extui %14 : vector<72x512xi1> to vector<72x512xi32>
    %16 = arith.sitofp %15 : vector<72x512xi32> to vector<72x512xf32>
    %cst = arith.constant dense<0.000000e+00> : vector<32x512xf32>
    %17 = tpu.matmul %0, %16, %cst {dimension_numbers = #tpu.dot_dimension_numbers<[1], [0], [0], [1], [0, 0, 1, 1], [], []>, precision = #tpu.contract_precision<fp32>} : vector<32x72xf32>, vector<72x512xf32>, vector<32x512xf32> -> vector<32x512xf32>
    %18 = vector.broadcast %5 : vector<1x512xf32> to vector<32x512xf32>
    %19 = vector.broadcast %1 : vector<32x1xf32> to vector<32x512xf32>
    %20 = arith.mulf %18, %19 : vector<32x512xf32>
    %21 = arith.addf %17, %20 : vector<32x512xf32>
    %22 = tpu.transpose %21, [1, 0] : vector<32x512xf32> -> vector<512x32xf32>
    %c0_7 = arith.constant 0 : index
    %c0_8 = arith.constant 0 : index
    %23 = vector.load %arg5[%c0_7, %c0_8] : memref<512x32xf32, #tpu.memory_space<vmem>>, vector<512x32xf32>
    tpu.vector_store %arg5[%c0_7, %c0_8], %22 {strides = array<i32>} : memref<512x32xf32, #tpu.memory_space<vmem>>, vector<512x32xf32>,
    return
  }
  func.func @transform_0(%arg0: i32) -> (i32, i32) {
    %c0_i32 = arith.constant 0 : i32
    %c0_i32_0 = arith.constant 0 : i32
    return %c0_i32, %arg0 : i32, i32
  }
  func.func @transform_1(%arg0: i32) -> (i32, i32) {
    %c0_i32 = arith.constant 0 : i32
    %c0_i32_0 = arith.constant 0 : i32
    return %c0_i32, %arg0 : i32, i32
  }
  func.func @transform_2(%arg0: i32) -> (i32, i32) {
    %c0_i32 = arith.constant 0 : i32
    %c0_i32_0 = arith.constant 0 : i32
    %c0_i32_1 = arith.constant 0 : i32
    return %c0_i32, %c0_i32_0 : i32, i32
  }
  func.func @transform_3(%arg0: i32) -> (i32, i32) {
    %c0_i32 = arith.constant 0 : i32
    %c0_i32_0 = arith.constant 0 : i32
    %c0_i32_1 = arith.constant 0 : i32
    return %c0_i32, %c0_i32_0 : i32, i32
  }
  func.func @transform_4(%arg0: i32) -> (i32, i32) {
    %c0_i32 = arith.constant 0 : i32
    %c0_i32_0 = arith.constant 0 : i32
    return %arg0, %c0_i32 : i32, i32
  }
}

</mosaic_0001>

<bundles_post_ra>
// kernel: tpu_custom_call.1
= control target key start
LH: loop header
LB: loop body
LE: loop exit
PB: predicated region body
PF: predicated region fallthrough
CT: control target
= control target key end

     0   :  { %9 = vsyncpa [#allocation3], 0  ;;  %s3541_s0 = inlined_call_operand.hbm [shape: s32[1,512], index: 0, kind: input, shape index: {}]   ;;  %s3542_s1 = inlined_call_operand.hbm [shape: s32[1,512], index: 1, kind: input, shape index: {}]   ;;  %s3543_s2 = inlined_call_operand.vmem [shape: f32[32,72], index: 2, kind: input, shape index: {}]   ;;  %s3544_s3 = inlined_call_operand.vmem [shape: f32[32,1], index: 3, kind: input, shape index: {}]   ;;  %s3545_s4 = inlined_call_operand.vmem [shape: f32[512,32], index: 4, kind: output, shape index: {}]  }
   0x1   :  { %s16_s17 = sshll.u32 %s3541_s0, 4  ;;  %s17_s17 = int_to_ptr.hbm [resolvable:$true] %s16_s17 }
   0x2   :  { %10 = vsyncpa [#allocation5], 0  ;;  %s2015_s18 = smov [#allocation2]   ;;  %s27_s22 = sshll.u32 %s3542_s1, 4  ;;  %s28_s22 = int_to_ptr.hbm [resolvable:$true] %s27_s22 }
   0x3   :  { %s18_s19 = sshll.u32 %s2015_s18, 4  ;;  %s2016_s23 = smov [#allocation4]   ;;  %s19_s19 = int_to_ptr.vmem [resolvable:$true] %s18_s19 }
   0x4   :  { %21 = dma.hbm_to_vmem [thread:$0]  %s17_s17, 64, %s19_s19, [#allocation3]  }
   0x5   :  { %s29_s24 = sshll.u32 %s2016_s23, 4  ;;  %s30_s24 = int_to_ptr.vmem [resolvable:$true] %s29_s24 }
   0x6   :  { %32 = dma.hbm_to_vmem [thread:$0]  %s28_s22, 64, %s30_s24, [#allocation5]  }
   0x7   :  { %2011 = dma.done.wait [#allocation3], 64  }
   0x8   :  { %2012 = vsyncadd [#allocation3], 4294967232 }
   0x9   :  { %2013 = dma.done.wait [#allocation5], 64  }
   0xa   :  { %2014 = vsyncadd [#allocation5], 4294967232  ;;  %v53_v0 = vlaneseq  ;;  %vm228_vm0 = vcmask 588800   ;;  %v63_v2 = vld [vmem:[#allocation2] sm:$0xf]  ;;  %v46_v4 = vld [vmem:[%s3543_s2 + $0x8] sm:$0xff] }
   0xb   :  { %v45_v3 = vld [vmem:[%s3543_s2] sm:$0xff]  ;;  %v66_v5 = vadd.s32 32, %v63_v2  ;;  %v233_v7 = vsel %vm228_vm0, %v46_v4, 0  ;;  %v47_v8 = vld [vmem:[%s3543_s2 + $0x10] sm:$0xff]  ;;  %v2017_v28 = vmov 0   ;;  %v2018_v31 = vmov 1.0  }
   0xc   :  { %v2051_v1 = vshrl.u32 %v53_v0, 7  ;;  %v230_v6 = vsel %vm228_vm0, %v45_v3, 0  ;;  %v2066_v10 = vand.u32 4294901760, %v233_v7  ;;  %v236_v11 = vsel %vm228_vm0, %v47_v8, 0  ;;  %1961 = vset.pattern.permute.xlu0 %v2017_v28  ;;  %v49_v29 = vld [vmem:[%s3544_s3] sm:$0xff]  ;;  %1962 = vset.pattern.permute.xlu1 %v2017_v28  ;;  %v50_v53 = vld [vmem:[%s3544_s3 + $0x8] sm:$0xff] }
   0xd   :  { %v2064_v9 = vand.u32 4294901760, %v230_v6  ;;  %vm67_vm1 = vcmp.gt.s32.totalorder %v66_v5, 0  ;;  %v2078_v16 = vand.u32 4294901760, %v236_v11  ;;  %194 = vperm.xlu0 %1961, %v49_v29   ;;  %v2019_v32 = vmov 0.0  }
   0xe   :  { %v2070_v12 = vadd.s32 64, %v2051_v1  ;;  %v68_v13 = vsel %vm67_vm1, %v66_v5, 0  ;;  %v2076_v15 = vsub.f32 %v233_v7, %v2066_v10  ;;  %v2081_v17 = vadd.s32 56, %v2051_v1 }
   0xf   :  { %v2073_v14 = vsub.f32 %v230_v6, %v2064_v9  ;;  %vm69_vm2 = vcmp.lt.s32.totalorder %v68_v13, 64  ;;  %v2084_v18 = vadd.s32 48, %v2051_v1  ;;  %v2087_v19 = vadd.s32 40, %v2051_v1 }
  0x10   :  { %v2089_v20 = vsel %vm69_vm2, %v68_v13, 64  ;;  %v2092_v21 = vadd.s32 32, %v2051_v1  ;;  %v2098_v23 = vadd.s32 24, %v2051_v1  ;;  %v2101_v24 = vadd.s32 16, %v2051_v1 }
  0x11   :  { %v2095_v22 = vperm.slane %v2089_v20, 0  ;;  %v2104_v25 = vadd.s32 8, %v2051_v1  ;;  %v2107_v26 = vand.u32 4294901760, %v2073_v14  ;;  %v2110_v27 = vand.u32 4294901760, %v2076_v15 }
  0x12   :  { %v2116_v30 = vsub.f32 %v236_v11, %v2078_v16  ;;  %v2231_v56 = vperm.slane %v2089_v20, 1 }
  0x13   :  { %vm107_vm3 = vcmp.eq.s32.totalorder %v2070_v12, %v2095_v22  ;;  %vm103_vm4 = vcmp.eq.s32.totalorder %v2081_v17, %v2095_v22  ;;  %vm99_vm5 = vcmp.eq.s32.totalorder %v2084_v18, %v2095_v22  ;;  %vm95_vm6 = vcmp.eq.s32.totalorder %v2087_v19, %v2095_v22 }
  0x14   :  { %1848 = vmatpush.msk.msra.mxu0 %vm107_vm3, %v2018_v31  ;;  %v1844_v33 = vsel %vm107_vm3, 1.0, %v2019_v32  ;;  %v1840_v34 = vsel %vm103_vm4, 1.0, %v2019_v32  ;;  %1857 = vmatpush.msk.msra.mxu3 %vm107_vm3, %v2018_v31  ;;  %v1836_v35 = vsel %vm99_vm5, 1.0, %v2019_v32  ;;  %vm91_vm7 = vcmp.eq.s32.totalorder %v2092_v21, %v2095_v22 }
  0x15   :  { %v2148_v36 = vsub.f32 %v1844_v33, %v1844_v33  ;;  %v2150_v37 = vsub.f32 %v1840_v34, %v1840_v34  ;;  %v2152_v38 = vsub.f32 %v1836_v35, %v1836_v35  ;;  %v1832_v39 = vsel %vm95_vm6, 1.0, %v2019_v32  ;;  %199 = vperm.xlu0 %1961, %v50_v53  }
  0x16   :  { %1849 = vmatpush.msk.msra.mxu0 %vm103_vm4, %v2018_v31  ;;  %1858 = vmatpush.msk.msra.mxu3 %vm103_vm4, %v2018_v31  ;;  %v2166_v40 = vsub.f32 %v1832_v39, %v1832_v39  ;;  %vm87_vm8 = vcmp.eq.s32.totalorder %v2098_v23, %v2095_v22  ;;  %v1828_v41 = vsel %vm91_vm7, 1.0, %v2019_v32  ;;  %vm83_vm9 = vcmp.eq.s32.totalorder %v2101_v24, %v2095_v22 }
  0x17   :  { %386 = vmatpush.msra.mxu2 %v2148_v36  ;;  %v308_v42 = vand.u32 4294901760, %v2148_v36  ;;  %v314_v43 = vand.u32 4294901760, %v2150_v37  ;;  %v2179_v44 = vsub.f32 %v1828_v41, %v1828_v41  ;;  %v320_v45 = vand.u32 4294901760, %v2152_v38 }
  0x18   :  { %1850 = vmatpush.msk.msra.mxu0 %vm99_vm5, %v2018_v31  ;;  %1859 = vmatpush.msk.msra.mxu3 %vm99_vm5, %v2018_v31  ;;  %v1824_v46 = vsel %vm87_vm8, 1.0, %v2019_v32  ;;  %vm79_vm10 = vcmp.eq.s32.totalorder %v2104_v25, %v2095_v22  ;;  %v326_v47 = vand.u32 4294901760, %v2166_v40  ;;  %v1820_v48 = vsel %vm83_vm9, 1.0, %v2019_v32 }
  0x19   :  { %389 = vmatpush.msra.mxu2 %v2150_v37  ;;  %v309_v49 = vsub.f32 %v2148_v36, %v308_v42  ;;  %v315_v50 = vsub.f32 %v2150_v37, %v314_v43  ;;  %v321_v51 = vsub.f32 %v2152_v38, %v320_v45  ;;  %v2211_v52 = vsub.f32 %v1824_v46, %v1824_v46 }
  0x1a   :  { %1851 = vmatpush.msk.msra.mxu0 %vm95_vm6, %v2018_v31  ;;  %1860 = vmatpush.msk.msra.mxu3 %vm95_vm6, %v2018_v31  ;;  %v2224_v54 = vsub.f32 %v1820_v48, %v1820_v48  ;;  %vm3546_vm11 = vcmp.eq.s32.totalorder %v2051_v1, %v2095_v22  ;;  %v269_v55 = vsub.f32 %v2073_v14, %v2107_v26  ;;  %v332_v60 = vand.u32 4294901760, %v2179_v44 }
  0x1b   :  { %392 = vmatpush.msra.mxu2 %v2152_v38  ;;  %v310_v57 = vand.u32 4294901760, %v309_v49  ;;  %v316_v58 = vand.u32 4294901760, %v315_v50  ;;  %v327_v59 = vsub.f32 %v2166_v40, %v326_v47  ;;  %v322_v61 = vand.u32 4294901760, %v321_v51 }
  0x1c   :  { %1852 = vmatpush.msk.msra.mxu0 %vm91_vm7, %v2018_v31  ;;  %1861 = vmatpush.msk.msra.mxu3 %vm91_vm7, %v2018_v31  ;;  %v1816_v62 = vsel %vm79_vm10, 1.0, %v2019_v32  ;;  %v338_v63 = vand.u32 4294901760, %v2211_v52  ;;  %v1812_v0 = vsel %vm3546_vm11, 1.0, %v2019_v32  ;;  %v333_v2 = vsub.f32 %v2179_v44, %v332_v60 }
  0x1d   :  { %311 = vmatpush.msra.mxu1 %v310_v57  ;;  %395 = vmatpush.msra.mxu2 %v2166_v40  ;;  %v2259_v3 = vsub.f32 %v1816_v62, %v1816_v62  ;;  %v2261_v4 = vsub.f32 %v1812_v0, %v1812_v0  ;;  %v344_v5 = vand.u32 4294901760, %v2224_v54  ;;  %vm3547_vm12 = vcmp.eq.s32.totalorder %v2070_v12, %v2231_v56 }
  0x1e   :  { %1853 = vmatpush.msk.msra.mxu0 %vm87_vm8, %v2018_v31  ;;  %1862 = vmatpush.msk.msra.mxu3 %vm87_vm8, %v2018_v31  ;;  %v277_v6 = vsub.f32 %v2076_v15, %v2110_v27  ;;  %vm104_vm13 = vcmp.eq.s32.totalorder %v2081_v17, %v2231_v56  ;;  %v2279_v7 = vand.u32 4294901760, %v2116_v30  ;;  %v328_v8 = vand.u32 4294901760, %v327_v59 }
  0x1f   :  { %317 = vmatpush.msra.mxu1 %v316_v58  ;;  %398 = vmatpush.msra.mxu2 %v2179_v44  ;;  %v339_v11 = vsub.f32 %v2211_v52, %v338_v63  ;;  %v350_v13 = vand.u32 4294901760, %v2259_v3  ;;  %v1845_v28 = vsel %vm3547_vm12, 1.0, %v2019_v32  ;;  %v2294_v29 = vand.u32 4294901760, %v269_v55  ;;  %v48_v58 = vld [vmem:[%s3543_s2 + $0x18] sm:$0xff] }
  0x20   :  { %1854 = vmatpush.msk.msra.mxu0 %vm83_vm9, %v2018_v31  ;;  %1863 = vmatpush.msk.msra.mxu3 %vm83_vm9, %v2018_v31  ;;  %v345_v33 = vsub.f32 %v2224_v54, %v344_v5  ;;  %v2303_v34 = vsub.f32 %v1845_v28, %v1845_v28  ;;  %v1841_v35 = vsel %vm104_vm13, 1.0, %v2019_v32  ;;  %v334_v39 = vand.u32 4294901760, %v333_v2 }
  0x21   :  { %323 = vmatpush.msra.mxu1 %v322_v61  ;;  %401 = vmatpush.msra.mxu2 %v2211_v52  ;;  %v356_v41 = vand.u32 4294901760, %v2261_v4  ;;  %v2311_v46 = vsub.f32 %v1841_v35, %v1841_v35  ;;  %vm100_vm14 = vcmp.eq.s32.totalorder %v2084_v18, %v2231_v56  ;;  %v2324_v49 = vand.u32 4294901760, %v277_v6  ;;  %v51_v52 = vld [vmem:[%s3544_s3 + $0x10] sm:$0xff] }
  0x22   :  { %1855 = vmatpush.msk.msra.mxu0 %vm79_vm10, %v2018_v31  ;;  %1864 = vmatpush.msk.msra.mxu3 %vm79_vm10, %v2018_v31  ;;  %v651_v48 = vand.u32 4294901760, %v2303_v34  ;;  %v1837_v50 = vsel %vm100_vm14, 1.0, %v2019_v32  ;;  %vm96_vm15 = vcmp.eq.s32.totalorder %v2087_v19, %v2231_v56  ;;  %v340_v51 = vand.u32 4294901760, %v339_v11 }
  0x23   :  { %329 = vmatpush.msra.mxu1 %v328_v8  ;;  %404 = vmatpush.msra.mxu2 %v2224_v54  ;;  %v351_v53 = vsub.f32 %v2259_v3, %v350_v13  ;;  %v657_v55 = vand.u32 4294901760, %v2311_v46  ;;  %v2337_v57 = vsub.f32 %v1837_v50, %v1837_v50  ;;  %v346_v59 = vand.u32 4294901760, %v345_v33 }
  0x24   :  { %1856 = vmatpush.msk.msra.mxu0 %vm3546_vm11, %v2018_v31  ;;  %1865 = vmatpush.msk.msra.mxu3 %vm3546_vm11, %v2018_v31  ;;  %v652_v61 = vsub.f32 %v2303_v34, %v651_v48  ;;  %v1833_v62 = vsel %vm96_vm15, 1.0, %v2019_v32  ;;  %vm92_vm1 = vcmp.eq.s32.totalorder %v2092_v21, %v2231_v56  ;;  %v357_v0 = vsub.f32 %v2261_v4, %v356_v41 }
  0x25   :  { %271 = vmatmul.f32.vlgmr.msra.gmra.mxu0 %v2294_v29  ;;  %335 = vmatpush.msra.mxu1 %v334_v39  ;;  %v658_v2 = vsub.f32 %v2311_v46, %v657_v55  ;;  %v663_v6 = vand.u32 4294901760, %v2337_v57  ;;  %v2367_v8 = vsub.f32 %v1833_v62, %v1833_v62  ;;  %v1829_v28 = vsel %vm92_vm1, 1.0, %v2019_v32 }
  0x26   :  { %407 = vmatpush.msra.mxu2 %v2259_v3  ;;  %460 = vmatmul.f32.vlgmr.msra.gmra.mxu3 %v2107_v26  ;;  %v653_v11 = vand.u32 4294901760, %v652_v61  ;;  %vm88_vm2 = vcmp.eq.s32.totalorder %v2098_v23, %v2231_v56  ;;  %v239_v33 = vsel %vm228_vm0, %v48_v58, 0  ;;  %v352_v35 = vand.u32 4294901760, %v351_v53 }
  0x27   :  { %341 = vmatpush.msra.mxu1 %v340_v51  ;;  %492 = vmatpush.msrb.mxu0 %v308_v42  ;;  %v659_v39 = vand.u32 4294901760, %v658_v2  ;;  %v669_v50 = vand.u32 4294901760, %v2367_v8  ;;  %v2381_v62 = vsub.f32 %v1829_v28, %v1829_v28  ;;  %v664_v61 = vsub.f32 %v2337_v57, %v663_v6 }
  0x28   :  { %410 = vmatpush.msra.mxu2 %v2261_v4  ;;  %654 = vmatpush.msrb.mxu3 %v653_v11  ;;  %v1825_v51 = vsel %vm88_vm2, 1.0, %v2019_v32  ;;  %vm84_vm0 = vcmp.eq.s32.totalorder %v2101_v24, %v2231_v56  ;;  %vm80_vm11 = vcmp.eq.s32.totalorder %v2104_v25, %v2231_v56  ;;  %v358_v36 = vand.u32 4294901760, %v357_v0 }
  0x29   :  { %413 = vmatmul.f32.vlgmr.msra.gmra.mxu2 %v2073_v14  ;;  %347 = vmatpush.msra.mxu1 %v346_v59  ;;  %v675_v42 = vand.u32 4294901760, %v2381_v62  ;;  %v2397_v53 = vand.u32 4294901760, %v239_v33  ;;  %v2399_v58 = vsub.f32 %v1825_v51, %v1825_v51  ;;  %v670_v2 = vsub.f32 %v2367_v8, %v669_v50 }
  0x2a   :  { %1875 = vmatpush.msk.msrb.mxu2 %vm3547_vm12, %v2018_v31  ;;  %496 = vmatpush.msrb.mxu0 %v314_v43  ;;  %v1821_v59 = vsel %vm84_vm0, 1.0, %v2019_v32  ;;  %v1817_v0 = vsel %vm80_vm11, 1.0, %v2019_v32  ;;  %vm76_vm12 = vcmp.eq.s32.totalorder %v2051_v1, %v2231_v56  ;;  %v665_v37 = vand.u32 4294901760, %v664_v61 }
  0x2b   :  { %353 = vmatpush.msra.mxu1 %v352_v35  ;;  %660 = vmatpush.msrb.mxu3 %v659_v39  ;;  %v2418_v11 = vsub.f32 %v1821_v59, %v1821_v59  ;;  %v676_v43 = vsub.f32 %v2381_v62, %v675_v42  ;;  %v681_v28 = vand.u32 4294901760, %v2399_v58  ;;  %v285_v35 = vsub.f32 %v2116_v30, %v2279_v7 }
  0x2c   :  { %1876 = vmatpush.msk.msrb.mxu2 %vm104_vm13, %v2018_v31  ;;  %500 = vmatpush.msrb.mxu0 %v320_v45  ;;  %v2436_v39 = vsub.f32 %v239_v33, %v2397_v53  ;;  %v2438_v51 = vsub.f32 %v1817_v0, %v1817_v0  ;;  %v671_v38 = vand.u32 4294901760, %v670_v2  ;;  %v1813_v45 = vsel %vm76_vm12, 1.0, %v2019_v32 }
  0x2d   :  { %279 = vmatmul.f32.gmra.mxu0 %v2324_v49  ;;  %359 = vmatpush.msra.mxu1 %v358_v36  ;;  %v687_v33 = vand.u32 4294901760, %v2418_v11  ;;  %v677_v61 = vand.u32 4294901760, %v676_v43  ;;  %v682_v36 = vsub.f32 %v2399_v58, %v681_v28  ;;  %v2465_v2 = vand.u32 4294901760, %v285_v35 }
  0x2e   :  { %361 = vmatmul.f32.vlgmr.msra.gmra.mxu1 %v2064_v9  ;;  %466 = vmatmul.f32.gmra.mxu3 %v2110_v27  ;;  %v2468_v59 = vand.u32 4294901760, %v2436_v39  ;;  %v693_v40 = vand.u32 4294901760, %v2438_v51 }
  0x2f   :  { %1866 = vmatpush.msk.msrb.mxu1 %vm107_vm3, %v2018_v31  ;;  %1877 = vmatpush.msk.msrb.mxu2 %vm100_vm14, %v2018_v31  ;;  %v688_v0 = vsub.f32 %v2418_v11, %v687_v33  ;;  %vm3548_vm3 = vcmp.eq.s32.totalorder %v2051_v1, %v2095_v22  ;;  %v2577_v22 = vperm.slane %v2089_v20, 2 }
  0x30   :  { %666 = vmatpush.msrb.mxu3 %v665_v37  ;;  %504 = vmatpush.msrb.mxu0 %v326_v47  ;;  %v2471_v47 = vsub.f32 %v1813_v45, %v1813_v45  ;;  %v683_v37 = vand.u32 4294901760, %v682_v36  ;;  %v293_v44 = vsub.f32 %v2436_v39, %v2468_v59 }
  0x31   :  { %418 = vmatmul.f32.gmra.mxu2 %v2076_v15  ;;  %1867 = vmatpush.msk.msrb.mxu1 %vm103_vm4, %v2018_v31  ;;  %v689_v35 = vand.u32 4294901760, %v688_v0  ;;  %vm3549_vm4 = vcmp.eq.s32.totalorder %v2070_v12, %v2231_v56 }
  0x32   :  { %1878 = vmatpush.msk.msrb.mxu2 %vm96_vm15, %v2018_v31  ;;  %672 = vmatpush.msrb.mxu3 %v671_v38  ;;  %v699_v43 = vand.u32 4294901760, %v2471_v47  ;;  %v2514_v38 = vand.u32 4294901760, %v293_v44 }
  0x33   :  { %1868 = vmatpush.msk.msrb.mxu1 %vm99_vm5, %v2018_v31  ;;  %508 = vmatpush.msrb.mxu0 %v332_v60  ;;  %v694_v60 = vsub.f32 %v2438_v51, %v693_v40  ;;  %vm3550_vm5 = vmmov %vm3549_vm4 }
  0x34   :  { %1879 = vmatpush.msk.msrb.mxu2 %vm92_vm1, %v2018_v31  ;;  %678 = vmatpush.msrb.mxu3 %v677_v61  ;;  %v700_v61 = vsub.f32 %v2471_v47, %v699_v43 }
  0x35   :  { %287 = vmatmul.f32.gmra.mxu0 %v2465_v2  ;;  %1869 = vmatpush.msk.msrb.mxu1 %vm95_vm6, %v2018_v31  ;;  %v695_v45 = vand.u32 4294901760, %v694_v60  ;;  %vm109_vm6 = vcmp.eq.s32.totalorder %v2070_v12, %v2577_v22 }
  0x36   :  { %365 = vmatmul.f32.gmra.mxu1 %v2066_v10  ;;  %472 = vmatmul.f32.gmra.mxu3 %v2279_v7  ;;  %v701_v54 = vand.u32 4294901760, %v700_v61  ;;  %v1846_v3 = vsel %vm109_vm6, 1.0, %v2019_v32 }
  0x37   :  { %1880 = vmatpush.msk.msrb.mxu2 %vm88_vm2, %v2018_v31  ;;  %1870 = vmatpush.msk.msrb.mxu1 %vm91_vm7, %v2018_v31  ;;  %v2618_v4 = vsub.f32 %v1846_v3, %v1846_v3  ;;  %vm105_vm7 = vcmp.eq.s32.totalorder %v2081_v17, %v2577_v22 }
  0x38   :  { %512 = vmatpush.msrb.mxu0 %v338_v63  ;;  %684 = vmatpush.msrb.mxu3 %v683_v37  ;;  %v52_v63 = vld [vmem:[%s3544_s3 + $0x18] sm:$0xff] }
  0x39   :  { %423 = vmatmul.f32.gmra.mxu2 %v2116_v30  ;;  %1871 = vmatpush.msk.msrb.mxu1 %vm87_vm8, %v2018_v31  ;;  %vm101_vm8 = vcmp.eq.s32.totalorder %v2084_v18, %v2577_v22 }
  0x3a   :  { %516 = vmatpush.msrb.mxu0 %v344_v5  ;;  %1881 = vmatpush.msk.msrb.mxu2 %vm84_vm0, %v2018_v31  ;;  %v1842_v5 = vsel %vm105_vm7, 1.0, %v2019_v32 }
  0x3b   :  { %690 = vmatpush.msrb.mxu3 %v689_v35  ;;  %1872 = vmatpush.msk.msrb.mxu1 %vm83_vm9, %v2018_v31  ;;  %vm97_vm9 = vcmp.eq.s32.totalorder %v2087_v19, %v2577_v22 }
  0x3c   :  { %520 = vmatpush.msrb.mxu0 %v350_v13  ;;  %1882 = vmatpush.msk.msrb.mxu2 %vm80_vm11, %v2018_v31  ;;  %v994_v13 = vand.u32 4294901760, %v2618_v4 }
  0x3d   :  { %295 = vmatmul.f32.gmra.mxu0 %v2514_v38  ;;  %696 = vmatpush.msrb.mxu3 %v695_v45 }
  0x3e   :  { %369 = vmatmul.f32.gmra.mxu1 %v2078_v16  ;;  %478 = vmatmul.f32.gmra.mxu3 %v2468_v59 }
  0x3f   :  { %524 = vmatpush.msrb.mxu0 %v356_v41  ;;  %204 = vperm.xlu1 %1962, %v51_v52   ;;  %v1838_v41 = vsel %vm101_vm8, 1.0, %v2019_v32 }
  0x40   :  { %1873 = vmatpush.msk.msrb.mxu1 %vm79_vm10, %v2018_v31  ;;  %1883 = vmatpush.msk.msrb.mxu2 %vm76_vm12, %v2018_v31  ;;  %vm93_vm10 = vcmp.eq.s32.totalorder %v2092_v21, %v2577_v22 }
  0x41   :  { %428 = vmatmul.f32.gmra.mxu2 %v2436_v39  ;;  %702 = vmatpush.msrb.mxu3 %v701_v54 }
  0x42   :  { %835 = vmatpush.msra.mxu2 %v651_v48  ;;  %1874 = vmatpush.msk.msrb.mxu1 %vm3548_vm3, %v2018_v31  ;;  %v995_v48 = vsub.f32 %v2618_v4, %v994_v13 }
  0x43   :  { %729 = vmatpush.msra.mxu0 %v2303_v34  ;;  %1893 = vmatpush.msk.msra.mxu3 %vm3549_vm4, %v2018_v31  ;;  %v2645_v34 = vsub.f32 %v1842_v5, %v1842_v5 }
  0x44   :  { %1884 = vmatpush.msk.msra.mxu1 %vm3550_vm5, %v2018_v31  ;;  %839 = vmatpush.msra.mxu2 %v657_v55 }
  0x45   :  { %526 = vmatmul.f32.vlgmr.msrb.gmra.mxu0 %v2064_v9  ;;  %1894 = vmatpush.msk.msra.mxu3 %vm104_vm13, %v2018_v31  ;;  %v1000_v55 = vand.u32 4294901760, %v2645_v34 }
  0x46   :  { %373 = vmatmul.f32.gmra.mxu1 %v2397_v53  ;;  %704 = vmatmul.f32.vlgmr.msrb.gmra.mxu3 %v2064_v9 }
  0x47   :  { %209 = vperm.xlu1 %1962, %v52_v63   ;;  %732 = vmatpush.msra.mxu0 %v2311_v46  ;;  %v2666_v46 = vsub.f32 %v1838_v41, %v1838_v41 }
  0x48   :  { %1885 = vmatpush.msk.msra.mxu1 %vm104_vm13, %v2018_v31  ;;  %843 = vmatpush.msra.mxu2 %v663_v6  ;;  %vm81_vm13 = vcmp.eq.s32.totalorder %v2104_v25, %v2577_v22 }
  0x49   :  { %614 = vmatmul.f32.vlgmr.msrb.gmra.mxu2 %v2294_v29  ;;  %735 = vmatpush.msra.mxu0 %v2337_v57  ;;  %v1834_v57 = vsel %vm97_vm9, 1.0, %v2019_v32  ;;  %v1818_v35 = vsel %vm81_vm13, 1.0, %v2019_v32 }
  0x4a   :  { %1895 = vmatpush.msk.msra.mxu3 %vm100_vm14, %v2018_v31  ;;  %847 = vmatpush.msra.mxu2 %v669_v50  ;;  %v2696_v6 = vsub.f32 %v1834_v57, %v1834_v57  ;;  %v996_v50 = vand.u32 4294901760, %v995_v48  ;;  %v2801_v61 = vsub.f32 %v1818_v35, %v1818_v35 }
  0x4b   :  { %1886 = vmatpush.msk.msra.mxu1 %vm100_vm14, %v2018_v31  ;;  %738 = vmatpush.msra.mxu0 %v2367_v8  ;;  %v1006_v8 = vand.u32 4294901760, %v2666_v46  ;;  %vm77_vm14 = vcmp.eq.s32.totalorder %v2051_v1, %v2577_v22 }
  0x4c   :  { %1896 = vmatpush.msk.msra.mxu3 %vm96_vm15, %v2018_v31  ;;  %851 = vmatpush.msra.mxu2 %v675_v42  ;;  %v1012_v42 = vand.u32 4294901760, %v2696_v6  ;;  %v1814_v63 = vsel %vm77_vm14, 1.0, %v2019_v32  ;;  %v1036_v41 = vand.u32 4294901760, %v2801_v61 }
  0x4d   :  { %530 = vmatmul.f32.gmra.mxu0 %v2066_v10  ;;  %1887 = vmatpush.msk.msra.mxu1 %vm96_vm15, %v2018_v31  ;;  %v2820_v48 = vsub.f32 %v1814_v63, %v1814_v63 }
  0x4e   :  { %568 = vmatmul.f32.vlgmr.msrb.gmra.mxu1 %v2064_v9  ;;  %708 = vmatmul.f32.gmra.mxu3 %v2066_v10  ;;  %v1013_v56 = vsub.f32 %v2696_v6, %v1012_v42 }
  0x4f   :  { %741 = vmatpush.msra.mxu0 %v2381_v62  ;;  %1897 = vmatpush.msk.msra.mxu3 %vm92_vm1, %v2018_v31  ;;  %v1001_v62 = vsub.f32 %v2645_v34, %v1000_v55 }
  0x50   :  { %855 = vmatpush.msra.mxu2 %v681_v28  ;;  %1888 = vmatpush.msk.msra.mxu1 %vm92_vm1, %v2018_v31  ;;  %v1007_v28 = vsub.f32 %v2666_v46, %v1006_v8  ;;  %v1014_v37 = vand.u32 4294901760, %v1013_v56 }
  0x51   :  { %622 = vmatmul.f32.gmra.mxu2 %v2324_v49  ;;  %744 = vmatpush.msra.mxu0 %v2399_v58  ;;  %v1830_v58 = vsel %vm93_vm10, 1.0, %v2019_v32 }
  0x52   :  { %1898 = vmatpush.msk.msra.mxu3 %vm88_vm2, %v2018_v31  ;;  %1889 = vmatpush.msk.msra.mxu1 %vm88_vm2, %v2018_v31 }
  0x53   :  { %747 = vmatpush.msra.mxu0 %v2418_v11  ;;  %859 = vmatpush.msra.mxu2 %v687_v33  ;;  %v1002_v33 = vand.u32 4294901760, %v1001_v62  ;;  %v1042_v62 = vand.u32 4294901760, %v2820_v48 }
  0x54   :  { %1899 = vmatpush.msk.msra.mxu3 %vm84_vm0, %v2018_v31  ;;  %1890 = vmatpush.msk.msra.mxu1 %vm84_vm0, %v2018_v31 }
  0x55   :  { %534 = vmatmul.f32.gmra.mxu0 %v2078_v16  ;;  %863 = vmatpush.msra.mxu2 %v693_v40 }
  0x56   :  { %572 = vmatmul.f32.gmra.mxu1 %v2066_v10  ;;  %712 = vmatmul.f32.gmra.mxu3 %v2078_v16 }
  0x57   :  { %750 = vmatpush.msra.mxu0 %v2438_v51  ;;  %1900 = vmatpush.msk.msra.mxu3 %vm80_vm11, %v2018_v31  ;;  %v2739_v51 = vsub.f32 %v1830_v58, %v1830_v58  ;;  %v2841_v58 = vperm.slane %v2089_v20, 3  ;;  %v1043_v20 = vsub.f32 %v2820_v48, %v1042_v62 }
  0x58   :  { %1891 = vmatpush.msk.msra.mxu1 %vm80_vm11, %v2018_v31  ;;  %867 = vmatpush.msra.mxu2 %v699_v43  ;;  %vm89_vm11 = vcmp.eq.s32.totalorder %v2098_v23, %v2577_v22 }
  0x59   :  { %630 = vmatmul.f32.gmra.mxu2 %v2465_v2  ;;  %753 = vmatpush.msra.mxu0 %v2471_v47  ;;  %v1826_v11 = vsel %vm89_vm11, 1.0, %v2019_v32  ;;  %v1018_v40 = vand.u32 4294901760, %v2739_v51  ;;  %v1008_v47 = vand.u32 4294901760, %v1007_v28  ;;  %vm110_vm15 = vcmp.eq.s32.totalorder %v2070_v12, %v2841_v58  ;;  %v64_v12 = vld [vmem:[#allocation4] sm:$0xf] }
  0x5a   :  { %1901 = vmatpush.msk.msra.mxu3 %vm76_vm12, %v2018_v31  ;;  %1072 = vmatpush.msrb.mxu2 %v2618_v4  ;;  %v2750_v36 = vsub.f32 %v1826_v11, %v1826_v11  ;;  %v1847_v28 = vsel %vm110_vm15, 1.0, %v2019_v32  ;;  %vm106_vm1 = vcmp.eq.s32.totalorder %v2081_v17, %v2841_v58  ;;  %v1044_v56 = vand.u32 4294901760, %v1043_v20 }
  0x5b   :  { %1892 = vmatpush.msk.msra.mxu1 %vm76_vm12, %v2018_v31  ;;  %1902 = vmatpush.msk.msrb.mxu0 %vm109_vm6, %v2018_v31  ;;  %v1019_v0 = vsub.f32 %v2739_v51, %v1018_v40  ;;  %vm85_vm12 = vcmp.eq.s32.totalorder %v2101_v24, %v2577_v22  ;;  %vm102_vm2 = vcmp.eq.s32.totalorder %v2084_v18, %v2841_v58  ;;  %v3189_v17 = vcvt.s32.f32 %v64_v12 }
  0x5c   :  { %1911 = vmatpush.msk.msrb.mxu3 %vm109_vm6, %v2018_v31  ;;  %1075 = vmatpush.msrb.mxu2 %v2645_v34  ;;  %v1024_v44 = vand.u32 4294901760, %v2750_v36  ;;  %v1822_v60 = vsel %vm85_vm12, 1.0, %v2019_v32  ;;  %vm98_vm0 = vcmp.eq.s32.totalorder %v2087_v19, %v2841_v58  ;;  %vm94_vm3 = vcmp.eq.s32.totalorder %v2092_v21, %v2841_v58 }
  0x5d   :  { %997 = vmatpush.msrb.mxu1 %v996_v50  ;;  %538 = vmatmul.f32.gmra.mxu0 %v2397_v53  ;;  %v2786_v43 = vsub.f32 %v1822_v60, %v1822_v60  ;;  %v1020_v52 = vand.u32 4294901760, %v1019_v0  ;;  %v1037_v50 = vsub.f32 %v2801_v61, %v1036_v41  ;;  %v1843_v0 = vsel %vm106_vm1, 1.0, %v2019_v32 }
  0x5e   :  { %576 = vmatmul.f32.gmra.mxu1 %v2078_v16  ;;  %716 = vmatmul.f32.gmra.mxu3 %v2397_v53  ;;  %v1025_v45 = vsub.f32 %v2750_v36, %v1024_v44  ;;  %v1831_v20 = vsel %vm94_vm3, 1.0, %v2019_v32  ;;  %vm90_vm4 = vcmp.eq.s32.totalorder %v2098_v23, %v2841_v58  ;;  %vm86_vm5 = vcmp.eq.s32.totalorder %v2101_v24, %v2841_v58 }
  0x5f   :  { %1903 = vmatpush.msk.msrb.mxu0 %vm105_vm7, %v2018_v31  ;;  %1912 = vmatpush.msk.msrb.mxu3 %vm105_vm7, %v2018_v31  ;;  %v1030_v54 = vand.u32 4294901760, %v2786_v43  ;;  %v1038_v11 = vand.u32 4294901760, %v1037_v50  ;;  %v3201_v19 = vperm.slane %v3189_v17, 2  ;;  %v3204_v21 = vperm.slane %v3189_v17, 3 }
  0x60   :  { %1003 = vmatpush.msrb.mxu1 %v1002_v33  ;;  %1078 = vmatpush.msrb.mxu2 %v2666_v46  ;;  %v1026_v3 = vand.u32 4294901760, %v1025_v45  ;;  %v2867_v33 = vsub.f32 %v1847_v28, %v1847_v28  ;;  %v1839_v45 = vsel %vm102_vm2, 1.0, %v2019_v32  ;;  %v2972_v46 = vsub.f32 %v1831_v20, %v1831_v20 }
  0x61   :  { %638 = vmatmul.f32.gmra.mxu2 %v2514_v38  ;;  %1904 = vmatpush.msk.msrb.mxu0 %vm101_vm8, %v2018_v31  ;;  %v1031_v5 = vsub.f32 %v2786_v43, %v1030_v54  ;;  %v2914_v63 = vsub.f32 %v1839_v45, %v1839_v45 }
  0x62   :  { %1913 = vmatpush.msk.msrb.mxu3 %vm101_vm8, %v2018_v31  ;;  %1081 = vmatpush.msrb.mxu2 %v2696_v6 }
  0x63   :  { %1009 = vmatpush.msrb.mxu1 %v1008_v47  ;;  %1905 = vmatpush.msk.msrb.mxu0 %vm97_vm9, %v2018_v31  ;;  %v1032_v57 = vand.u32 4294901760, %v1031_v5  ;;  %v1337_v47 = vand.u32 4294901760, %v2867_v33  ;;  %v1349_v4 = vand.u32 4294901760, %v2914_v63  ;;  %v1835_v5 = vsel %vm98_vm0, 1.0, %v2019_v32 }
  0x64   :  { %1914 = vmatpush.msk.msrb.mxu3 %vm97_vm9, %v2018_v31  ;;  %1084 = vmatpush.msrb.mxu2 %v2739_v51  ;;  %v2946_v50 = vsub.f32 %v1835_v5, %v1835_v5 }
  0x65   :  { %756 = vmatmul.f32.vlgmr.msra.gmra.mxu0 %v2073_v14  ;;  %1015 = vmatpush.msrb.mxu1 %v1014_v37  ;;  %v2887_v37 = vsub.f32 %v1843_v0, %v1843_v0  ;;  %v1338_v60 = vsub.f32 %v2867_v33, %v1337_v47 }
  0x66   :  { %580 = vmatmul.f32.gmra.mxu1 %v2397_v53  ;;  %911 = vmatmul.f32.vlgmr.msra.gmra.mxu3 %v2064_v9 }
  0x67   :  { %1906 = vmatpush.msk.msrb.mxu0 %vm93_vm10, %v2018_v31  ;;  %1915 = vmatpush.msk.msrb.mxu3 %vm93_vm10, %v2018_v31  ;;  %v1343_v35 = vand.u32 4294901760, %v2887_v37 }
  0x68   :  { %1087 = vmatpush.msrb.mxu2 %v2750_v36  ;;  %1021 = vmatpush.msrb.mxu1 %v1020_v52  ;;  %v1339_v52 = vand.u32 4294901760, %v1338_v60 }
  0x69   :  { %869 = vmatmul.f32.vlgmr.msra.gmra.mxu2 %v2064_v9  ;;  %1907 = vmatpush.msk.msrb.mxu0 %vm89_vm11, %v2018_v31 }
  0x6a   :  { %1916 = vmatpush.msk.msrb.mxu3 %vm89_vm11, %v2018_v31  ;;  %1027 = vmatpush.msrb.mxu1 %v1026_v3  ;;  %v1344_v3 = vsub.f32 %v2887_v37, %v1343_v35 }
  0x6b   :  { %1908 = vmatpush.msk.msrb.mxu0 %vm85_vm12, %v2018_v31  ;;  %1090 = vmatpush.msrb.mxu2 %v2786_v43 }
  0x6c   :  { %1917 = vmatpush.msk.msrb.mxu3 %vm85_vm12, %v2018_v31  ;;  %1033 = vmatpush.msrb.mxu1 %v1032_v57  ;;  %v1350_v57 = vsub.f32 %v2914_v63, %v1349_v4 }
  0x6d   :  { %761 = vmatmul.f32.gmra.mxu0 %v2076_v15  ;;  %1093 = vmatpush.msrb.mxu2 %v2801_v61 }
  0x6e   :  { %803 = vmatmul.f32.vlgmr.msra.gmra.mxu1 %v2107_v26  ;;  %915 = vmatmul.f32.gmra.mxu3 %v2066_v10  ;;  %v1351_v34 = vand.u32 4294901760, %v1350_v57 }
  0x6f   :  { %1909 = vmatpush.msk.msrb.mxu0 %vm81_vm13, %v2018_v31  ;;  %1918 = vmatpush.msk.msrb.mxu3 %vm81_vm13, %v2018_v31 }
  0x70   :  { %1039 = vmatpush.msrb.mxu1 %v1038_v11  ;;  %1096 = vmatpush.msrb.mxu2 %v2820_v48 }
  0x71   :  { %873 = vmatmul.f32.gmra.mxu2 %v2066_v10  ;;  %1910 = vmatpush.msk.msrb.mxu0 %vm77_vm14, %v2018_v31 }
  0x72   :  { %1919 = vmatpush.msk.msrb.mxu3 %vm77_vm14, %v2018_v31  ;;  %1929 = vmatpush.msk.msra.mxu2 %vm110_vm15, %v2018_v31 }
  0x73   :  { %1045 = vmatpush.msrb.mxu1 %v1044_v56  ;;  %1178 = vmatpush.msra.mxu0 %v994_v13  ;;  %v1345_v13 = vand.u32 4294901760, %v1344_v3  ;;  %v1361_v56 = vand.u32 4294901760, %v2972_v46 }
  0x74   :  { %1930 = vmatpush.msk.msra.mxu2 %vm106_vm1, %v2018_v31  ;;  %1340 = vmatpush.msra.mxu3 %v1339_v52 }
  0x75   :  { %1920 = vmatpush.msk.msra.mxu1 %vm109_vm6, %v2018_v31  ;;  %766 = vmatmul.f32.gmra.mxu0 %v2116_v30  ;;  %v1362_v0 = vsub.f32 %v2972_v46, %v1361_v56  ;;  %vm82_vm6 = vcmp.eq.s32.totalorder %v2104_v25, %v2841_v58 }
  0x76   :  { %809 = vmatmul.f32.gmra.mxu1 %v2110_v27  ;;  %919 = vmatmul.f32.gmra.mxu3 %v2078_v16  ;;  %v1819_v52 = vsel %vm82_vm6, 1.0, %v2019_v32 }
  0x77   :  { %1182 = vmatpush.msra.mxu0 %v1000_v55  ;;  %1921 = vmatpush.msk.msra.mxu1 %vm105_vm7, %v2018_v31  ;;  %v1355_v55 = vand.u32 4294901760, %v2946_v50  ;;  %v1363_v3 = vand.u32 4294901760, %v1362_v0  ;;  %vm78_vm7 = vcmp.eq.s32.totalorder %v2051_v1, %v2841_v58 }
  0x78   :  { %1346 = vmatpush.msra.mxu3 %v1345_v13  ;;  %1931 = vmatpush.msk.msra.mxu2 %vm102_vm2, %v2018_v31  ;;  %v3029_v13 = vsub.f32 %v1819_v52, %v1819_v52  ;;  %v1815_v36 = vsel %vm78_vm7, 1.0, %v2019_v32 }
  0x79   :  { %877 = vmatmul.f32.gmra.mxu2 %v2078_v16  ;;  %1186 = vmatpush.msra.mxu0 %v1006_v8  ;;  %v1827_v8 = vsel %vm90_vm4, 1.0, %v2019_v32  ;;  %v1356_v11 = vsub.f32 %v2946_v50, %v1355_v55 }
  0x7a   :  { %1932 = vmatpush.msk.msra.mxu2 %vm98_vm0, %v2018_v31  ;;  %1922 = vmatpush.msk.msra.mxu1 %vm101_vm8, %v2018_v31  ;;  %v2983_v28 = vsub.f32 %v1827_v8, %v1827_v8  ;;  %vm1741_vm8 = vcmask 261120  }
  0x7b   :  { %1352 = vmatpush.msra.mxu3 %v1351_v34  ;;  %1190 = vmatpush.msra.mxu0 %v1012_v42  ;;  %v1357_v6 = vand.u32 4294901760, %v1356_v11  ;;  %v1823_v42 = vsel %vm86_vm5, 1.0, %v2019_v32  ;;  %v1379_v34 = vand.u32 4294901760, %v3029_v13 }
  0x7c   :  { %1923 = vmatpush.msk.msra.mxu1 %vm97_vm9, %v2018_v31  ;;  %1933 = vmatpush.msk.msra.mxu2 %vm94_vm3, %v2018_v31  ;;  %v1367_v60 = vand.u32 4294901760, %v2983_v28  ;;  %v3007_v45 = vsub.f32 %v1823_v42, %v1823_v42 }
  0x7d   :  { %771 = vmatmul.f32.gmra.mxu0 %v2436_v39  ;;  %1358 = vmatpush.msra.mxu3 %v1357_v6  ;;  %v1380_v32 = vsub.f32 %v3029_v13, %v1379_v34 }
  0x7e   :  { %815 = vmatmul.f32.gmra.mxu1 %v2279_v7  ;;  %923 = vmatmul.f32.gmra.mxu3 %v2397_v53  ;;  %v1368_v51 = vsub.f32 %v2983_v28, %v1367_v60 }
  0x7f   :  { %1194 = vmatpush.msra.mxu0 %v1018_v40  ;;  %1934 = vmatpush.msk.msra.mxu2 %vm90_vm4, %v2018_v31  ;;  %v1373_v40 = vand.u32 4294901760, %v3007_v45  ;;  %v3206_v23 = vpop.permute.xlu0 %194 }
  0x80   :  { %1924 = vmatpush.msk.msra.mxu1 %vm93_vm10, %v2018_v31  ;;  %1364 = vmatpush.msra.mxu3 %v1363_v3  ;;  %v1369_v5 = vand.u32 4294901760, %v1368_v51  ;;  %v3211_v24 = vmul.f32 %v3206_v23, %v3201_v19  ;;  %v3217_v1 = vmul.f32 %v3206_v23, %v3204_v21 }
  0x81   :  { %881 = vmatmul.f32.gmra.mxu2 %v2397_v53  ;;  %1198 = vmatpush.msra.mxu0 %v1024_v44  ;;  %v1374_v57 = vsub.f32 %v3007_v45, %v1373_v40  ;;  %v3054_v44 = vsub.f32 %v1815_v36, %v1815_v36 }
  0x82   :  { %1925 = vmatpush.msk.msra.mxu1 %vm89_vm11, %v2018_v31  ;;  %1935 = vmatpush.msk.msra.mxu2 %vm86_vm5, %v2018_v31 }
  0x83   :  { %1202 = vmatpush.msra.mxu0 %v1030_v54  ;;  %1370 = vmatpush.msra.mxu3 %v1369_v5  ;;  %v1375_v20 = vand.u32 4294901760, %v1374_v57  ;;  %v1385_v43 = vand.u32 4294901760, %v3054_v44  ;;  %v1381_v54 = vand.u32 4294901760, %v1380_v32 }
  0x84   :  { %1926 = vmatpush.msk.msra.mxu1 %vm85_vm12, %v2018_v31  ;;  %1936 = vmatpush.msk.msra.mxu2 %vm82_vm6, %v2018_v31 }
  0x85   :  { %957 = vmatmul.f32.vlgmr.msrb.gmra.mxu0 %v2294_v29  ;;  %1376 = vmatpush.msra.mxu3 %v1375_v20  ;;  %v1386_v8 = vsub.f32 %v3054_v44, %v1385_v43 }
  0x86   :  { %821 = vmatmul.f32.gmra.mxu1 %v2468_v59  ;;  %1146 = vmatmul.f32.vlgmr.msrb.gmra.mxu3 %v2107_v26 }
  0x87   :  { %1206 = vmatpush.msra.mxu0 %v1036_v41  ;;  %1927 = vmatpush.msk.msra.mxu1 %vm81_vm13, %v2018_v31  ;;  %v1387_v61 = vand.u32 4294901760, %v1386_v8  ;;  %v3240_v11 = vpop.permute.xlu0 %199 }
  0x88   :  { %1937 = vmatpush.msk.msra.mxu2 %vm78_vm7, %v2018_v31  ;;  %1382 = vmatpush.msra.mxu3 %v1381_v54 }
  0x89   :  { %1099 = vmatmul.f32.vlgmr.msrb.gmra.mxu2 %v2073_v14  ;;  %1210 = vmatpush.msra.mxu0 %v1042_v62 }
  0x8a   :  { %1521 = vmatpush.msrb.mxu2 %v1337_v47  ;;  %1928 = vmatpush.msk.msra.mxu1 %vm77_vm14, %v2018_v31 }
  0x8b   :  { %1415 = vmatpush.msrb.mxu0 %v2867_v33  ;;  %1388 = vmatpush.msra.mxu3 %v1387_v61  ;;  %v184_v33 = vperm.slane %v3189_v17, 0 }
  0x8c   :  { %1525 = vmatpush.msrb.mxu2 %v1343_v35 }
  0x8d   :  { %965 = vmatmul.f32.gmra.mxu0 %v2324_v49  ;;  %1947 = vmatpush.msk.msrb.mxu3 %vm110_vm15, %v2018_v31 }
  0x8e   :  { %1047 = vmatmul.f32.vlgmr.msrb.gmra.mxu1 %v2064_v9  ;;  %1152 = vmatmul.f32.gmra.mxu3 %v2110_v27 }
  0x8f   :  { %1938 = vmatpush.msk.msrb.mxu1 %vm110_vm15, %v2018_v31  ;;  %1418 = vmatpush.msrb.mxu0 %v2887_v37 }
  0x90   :  { %1948 = vmatpush.msk.msrb.mxu3 %vm106_vm1, %v2018_v31  ;;  %1529 = vmatpush.msrb.mxu2 %v1349_v4 }
  0x91   :  { %1104 = vmatmul.f32.gmra.mxu2 %v2076_v15  ;;  %1939 = vmatpush.msk.msrb.mxu1 %vm106_vm1, %v2018_v31 }
  0x92   :  { %1421 = vmatpush.msrb.mxu0 %v2914_v63  ;;  %1949 = vmatpush.msk.msrb.mxu3 %vm102_vm2, %v2018_v31 }
  0x93   :  { %1533 = vmatpush.msrb.mxu2 %v1355_v55  ;;  %1940 = vmatpush.msk.msrb.mxu1 %vm102_vm2, %v2018_v31 }
  0x94   :  { %1424 = vmatpush.msrb.mxu0 %v2946_v50  ;;  %1950 = vmatpush.msk.msrb.mxu3 %vm98_vm0, %v2018_v31 }
  0x95   :  { %973 = vmatmul.f32.gmra.mxu0 %v2465_v2  ;;  %1941 = vmatpush.msk.msrb.mxu1 %vm98_vm0, %v2018_v31 }
  0x96   :  { %1051 = vmatmul.f32.gmra.mxu1 %v2066_v10  ;;  %1158 = vmatmul.f32.gmra.mxu3 %v2279_v7 }
  0x97   :  { %1537 = vmatpush.msrb.mxu2 %v1361_v56  ;;  %1427 = vmatpush.msrb.mxu0 %v2972_v46  ;;  %v216_v56 = vmul.f32 %v3240_v11, %v184_v33 }
  0x98   :  { %1951 = vmatpush.msk.msrb.mxu3 %vm94_vm3, %v2018_v31  ;;  %1942 = vmatpush.msk.msrb.mxu1 %vm94_vm3, %v2018_v31 }
  0x99   :  { %1109 = vmatmul.f32.gmra.mxu2 %v2116_v30  ;;  %1430 = vmatpush.msrb.mxu0 %v2983_v28 }
  0x9a   :  { %1541 = vmatpush.msrb.mxu2 %v1367_v60  ;;  %1952 = vmatpush.msk.msrb.mxu3 %vm90_vm4, %v2018_v31 }
  0x9b   :  { %1433 = vmatpush.msrb.mxu0 %v3007_v45  ;;  %1943 = vmatpush.msk.msrb.mxu1 %vm90_vm4, %v2018_v31 }
  0x9c   :  { %1545 = vmatpush.msrb.mxu2 %v1373_v40  ;;  %1953 = vmatpush.msk.msrb.mxu3 %vm86_vm5, %v2018_v31 }
  0x9d   :  { %981 = vmatmul.f32.gmra.mxu0 %v2514_v38  ;;  %1944 = vmatpush.msk.msrb.mxu1 %vm86_vm5, %v2018_v31 }
  0x9e   :  { %1055 = vmatmul.f32.gmra.mxu1 %v2078_v16  ;;  %1164 = vmatmul.f32.gmra.mxu3 %v2468_v59 }
  0x9f   :  { %1436 = vmatpush.msrb.mxu0 %v3029_v13  ;;  %1549 = vmatpush.msrb.mxu2 %v1379_v34 }
  0xa0   :  { %1954 = vmatpush.msk.msrb.mxu3 %vm82_vm6, %v2018_v31  ;;  %1945 = vmatpush.msk.msrb.mxu1 %vm82_vm6, %v2018_v31 }
  0xa1   :  { %1114 = vmatmul.f32.gmra.mxu2 %v2436_v39  ;;  %1439 = vmatpush.msrb.mxu0 %v3054_v44 }
  0xa2   :  { %v272_v18 = vpop.f32.mrf.mxu0  ;;  %1553 = vmatpush.msrb.mxu2 %v1385_v43  ;;  %1955 = vmatpush.msk.msrb.mxu3 %vm78_vm7, %v2018_v31 }
  0xa3   :  { %1946 = vmatpush.msk.msrb.mxu1 %vm78_vm7, %v2018_v31 }
  0xa5   :  { %1212 = vmatmul.f32.vlgmr.msra.gmra.mxu0 %v2064_v9 }
  0xa6   :  { %1059 = vmatmul.f32.gmra.mxu1 %v2397_v53  ;;  %1390 = vmatmul.f32.vlgmr.msra.gmra.mxu3 %v2064_v9 }
  0xa9   :  { %1300 = vmatmul.f32.vlgmr.msra.gmra.mxu2 %v2294_v29  ;;  %v461_v25 = vpop.f32.mrf.mxu3 }
  0xaa   :  { %v280_v31 = vpop.f32.mrf.mxu0 }
  0xab   :  { %v362_v22 = vpop.f32.mrf.mxu1  ;;  %v281_v60 = vadd.f32 %v280_v31, %v216_v56 }
  0xac   :  { %v414_v41 = vpop.f32.mrf.mxu2 }
  0xad   :  { %1216 = vmatmul.f32.gmra.mxu0 %v2066_v10 }
  0xae   :  { %1254 = vmatmul.f32.vlgmr.msra.gmra.mxu1 %v2064_v9  ;;  %1394 = vmatmul.f32.gmra.mxu3 %v2066_v10 }
  0xb1   :  { %1308 = vmatmul.f32.gmra.mxu2 %v2324_v49  ;;  %v467_v48 = vpop.f32.mrf.mxu3  ;;  %v3225_v37 = vpop.permute.xlu1 %204  ;;  %v212_v49 = vmul.f32 %v3206_v23, %v184_v33 }
  0xb2   :  { %v288_v62 = vpop.f32.mrf.mxu0  ;;  %v3230_v29 = vmul.f32 %v3225_v37, %v3201_v19  ;;  %v3234_v35 = vmul.f32 %v3225_v37, %v3204_v21  ;;  %v220_v51 = vmul.f32 %v3225_v37, %v184_v33 }
  0xb3   :  { %v366_v58 = vpop.f32.mrf.mxu1  ;;  %v273_v55 = vadd.f32 %v272_v18, %v212_v49 }
  0xb4   :  { %v419_v47 = vpop.f32.mrf.mxu2  ;;  %v367_v3 = vadd.f32 %v366_v58, %v281_v60  ;;  %v289_v34 = vadd.f32 %v288_v62, %v220_v51 }
  0xb5   :  { %1220 = vmatmul.f32.gmra.mxu0 %v2078_v16  ;;  %v363_v28 = vadd.f32 %v362_v22, %v273_v55 }
  0xb6   :  { %1258 = vmatmul.f32.gmra.mxu1 %v2066_v10  ;;  %1398 = vmatmul.f32.gmra.mxu3 %v2078_v16  ;;  %v420_v57 = vadd.f32 %v419_v47, %v367_v3 }
  0xb7   :  { %v415_v0 = vadd.f32 %v414_v41, %v363_v28 }
  0xb9   :  { %1316 = vmatmul.f32.gmra.mxu2 %v2465_v2  ;;  %v473_v63 = vpop.f32.mrf.mxu3  ;;  %v462_v52 = vadd.f32 %v461_v25, %v415_v0  ;;  %v3252_v20 = vpop.permute.xlu1 %209 }
  0xba   :  { %v296_v4 = vpop.f32.mrf.mxu0 }
  0xbb   :  { %v370_v50 = vpop.f32.mrf.mxu1 }
  0xbc   :  { %v424_v46 = vpop.f32.mrf.mxu2  ;;  %v371_v32 = vadd.f32 %v370_v50, %v289_v34 }
  0xbd   :  { %1224 = vmatmul.f32.gmra.mxu0 %v2397_v53 }
  0xbe   :  { %1262 = vmatmul.f32.gmra.mxu1 %v2078_v16  ;;  %1402 = vmatmul.f32.gmra.mxu3 %v2397_v53  ;;  %v425_v12 = vadd.f32 %v424_v46, %v371_v32 }
  0xc1   :  { %1324 = vmatmul.f32.gmra.mxu2 %v2514_v38  ;;  %v479_v6 = vpop.f32.mrf.mxu3 }
  0xc2   :  { %v527_v2 = vpop.f32.mrf.mxu0 }
  0xc3   :  { %v374_v42 = vpop.f32.mrf.mxu1  ;;  %v528_v38 = vadd.f32 %v527_v2, %v462_v52 }
  0xc4   :  { %v429_v45 = vpop.f32.mrf.mxu2 }
  0xc5   :  { %1442 = vmatmul.f32.vlgmr.msrb.gmra.mxu0 %v2073_v14  ;;  %v468_v14 = vadd.f32 %v467_v48, %v420_v57 }
  0xc6   :  { %1266 = vmatmul.f32.gmra.mxu1 %v2397_v53  ;;  %1597 = vmatmul.f32.vlgmr.msrb.gmra.mxu3 %v2064_v9 }
  0xc9   :  { %1555 = vmatmul.f32.vlgmr.msrb.gmra.mxu2 %v2064_v9  ;;  %v705_v40 = vpop.f32.mrf.mxu3  ;;  %v224_v9 = vmul.f32 %v3252_v20, %v184_v33 }
  0xca   :  { %v531_v13 = vpop.f32.mrf.mxu0 }
  0xcb   :  { %v569_v5 = vpop.f32.mrf.mxu1  ;;  %v532_v54 = vadd.f32 %v531_v13, %v468_v14  ;;  %v297_v18 = vadd.f32 %v296_v4, %v224_v9 }
  0xcc   :  { %v615_v36 = vpop.f32.mrf.mxu2  ;;  %v570_v44 = vadd.f32 %v569_v5, %v528_v38 }
  0xcd   :  { %1447 = vmatmul.f32.gmra.mxu0 %v2076_v15  ;;  %v474_v15 = vadd.f32 %v473_v63, %v425_v12 }
  0xce   :  { %1489 = vmatmul.f32.vlgmr.msrb.gmra.mxu1 %v2107_v26  ;;  %1613 = vxpose.xlu2.b32.start [1/4] (short) %v570_v44, 128  ;;  %v375_v26 = vadd.f32 %v374_v42, %v297_v18 }
  0xcf   :  { %1601 = vmatmul.f32.gmra.mxu3 %v2066_v10 }
  0xd0   :  { %v430_v62 = vadd.f32 %v429_v45, %v375_v26 }
  0xd1   :  { %1559 = vmatmul.f32.gmra.mxu2 %v2066_v10  ;;  %v709_v43 = vpop.f32.mrf.mxu3 }
  0xd2   :  { %v535_v8 = vpop.f32.mrf.mxu0 }
  0xd3   :  { %v573_v61 = vpop.f32.mrf.mxu1  ;;  %v536_v22 = vadd.f32 %v535_v8, %v474_v15 }
  0xd4   :  { %v574_v25 = vadd.f32 %v573_v61, %v532_v54  ;;  %v623_v31 = vpop.f32.mrf.mxu2 }
  0xd5   :  { %1452 = vmatmul.f32.gmra.mxu0 %v2116_v30  ;;  %v185_v30 = vperm.slane %v3189_v17, 1 }
  0xd6   :  { %1495 = vmatmul.f32.gmra.mxu1 %v2110_v27  ;;  %1614 = vxpose.xlu2.b32.cont [2/4] (short) %v574_v25, 128  ;;  %v480_v27 = vadd.f32 %v479_v6, %v430_v62 }
  0xd7   :  { %1605 = vmatmul.f32.gmra.mxu3 %v2078_v16  ;;  %v213_v47 = vmul.f32 %v3206_v23, %v185_v30  ;;  %v217_v17 = vmul.f32 %v3240_v11, %v185_v30  ;;  %v221_v52 = vmul.f32 %v3225_v37, %v185_v30  ;;  %v225_v44 = vmul.f32 %v3252_v20, %v185_v30 }
  0xd9   :  { %1563 = vmatmul.f32.gmra.mxu2 %v2078_v16  ;;  %v713_v10 = vpop.f32.mrf.mxu3  ;;  %v616_v50 = vadd.f32 %v615_v36, %v213_v47 }
  0xda   :  { %v539_v41 = vpop.f32.mrf.mxu0 }
  0xdb   :  { %v577_v48 = vpop.f32.mrf.mxu1  ;;  %v540_v49 = vadd.f32 %v539_v41, %v480_v27 }
  0xdc   :  { %v578_v58 = vadd.f32 %v577_v48, %v536_v22  ;;  %v631_v33 = vpop.f32.mrf.mxu2 }
  0xdd   :  { %1457 = vmatmul.f32.gmra.mxu0 %v2436_v39  ;;  %v706_v39 = vadd.f32 %v705_v40, %v616_v50  ;;  %v632_v40 = vadd.f32 %v631_v33, %v221_v52 }
  0xde   :  { %1501 = vmatmul.f32.gmra.mxu1 %v2279_v7  ;;  %1615 = vxpose.xlu2.b32.cont [3/4] (short) %v578_v58, 128 }
  0xdf   :  { %1609 = vmatmul.f32.gmra.mxu3 %v2397_v53  ;;  %v714_v57 = vadd.f32 %v713_v10, %v632_v40 }
  0xe1   :  { %1567 = vmatmul.f32.gmra.mxu2 %v2397_v53  ;;  %v717_v16 = vpop.f32.mrf.mxu3  ;;  %v624_v53 = vadd.f32 %v623_v31, %v217_v17 }
  0xe2   :  { %v757_v63 = vpop.f32.mrf.mxu0 }
  0xe3   :  { %v581_v4 = vpop.f32.mrf.mxu1  ;;  %v758_v28 = vadd.f32 %v757_v63, %v706_v39  ;;  %v710_v0 = vadd.f32 %v709_v43, %v624_v53 }
  0xe4   :  { %v582_v55 = vadd.f32 %v581_v4, %v540_v49  ;;  %v639_v46 = vpop.f32.mrf.mxu2 }
  0xe5   :  { %v640_v43 = vadd.f32 %v639_v46, %v225_v44 }
  0xe6   :  { %1507 = vmatmul.f32.gmra.mxu1 %v2468_v59  ;;  %1616 = vxpose.xlu2.b32.end [4/4] (short) %v582_v55, 128 }
  0xe7   :  { %v718_v61 = vadd.f32 %v717_v16, %v640_v43 }
  0xe9   :  { %v912_v7 = vpop.f32.mrf.mxu3 }
  0xea   :  { %v762_v56 = vpop.f32.mrf.mxu0 }
  0xeb   :  { %v804_v6 = vpop.f32.mrf.mxu1  ;;  %v763_v3 = vadd.f32 %v762_v56, %v710_v0 }
  0xec   :  { %v805_v2 = vadd.f32 %v804_v6, %v758_v28  ;;  %v870_v42 = vpop.f32.mrf.mxu2  ;;  %v218_v28 = vmul.f32 %v3240_v11, %v3201_v19 }
  0xee   :  { %v871_v23 = vadd.f32 %v870_v42, %v805_v2 }
  0xf0   :  { %v913_v60 = vadd.f32 %v912_v7, %v871_v23 }
  0xf1   :  { %v916_v45 = vpop.f32.mrf.mxu3 }
  0xf2   :  { %v767_v51 = vpop.f32.mrf.mxu0  ;;  %1645 = vxpose.xlu0.b32.start [1/4] (short) %v913_v60, 128 }
  0xf3   :  { %v810_v59 = vpop.f32.mrf.mxu1  ;;  %v768_v14 = vadd.f32 %v767_v51, %v714_v57 }
  0xf4   :  { %v811_v38 = vadd.f32 %v810_v59, %v763_v3  ;;  %v874_v13 = vpop.f32.mrf.mxu2 }
  0xf6   :  { %v875_v5 = vadd.f32 %v874_v13, %v811_v38 }
  0xf8   :  { %v917_v34 = vadd.f32 %v916_v45, %v875_v5 }
  0xf9   :  { %v920_v36 = vpop.f32.mrf.mxu3 }
  0xfa   :  { %v772_v32 = vpop.f32.mrf.mxu0  ;;  %1646 = vxpose.xlu0.b32.cont [2/4] (short) %v917_v34, 128  ;;  %v226_v34 = vmul.f32 %v3252_v20, %v3201_v19 }
  0xfb   :  { %v816_v9 = vpop.f32.mrf.mxu1  ;;  %v773_v25 = vadd.f32 %v772_v32, %v718_v61 }
  0xfc   :  { %v817_v54 = vadd.f32 %v816_v9, %v768_v14  ;;  %v878_v37 = vpop.f32.mrf.mxu2 }
  0xfe   :  { %v879_v8 = vadd.f32 %v878_v37, %v817_v54 }
 0x100   :  { %v921_v12 = vadd.f32 %v920_v36, %v879_v8 }
 0x101   :  { %v924_v18 = vpop.f32.mrf.mxu3 }
 0x102   :  { %v958_v31 = vpop.f32.mrf.mxu0  ;;  %1647 = vxpose.xlu0.b32.cont [3/4] (short) %v921_v12, 128 }
 0x103   :  { %v822_v15 = vpop.f32.mrf.mxu1  ;;  %v959_v55 = vadd.f32 %v958_v31, %v3211_v24 }
 0x104   :  { %v823_v26 = vadd.f32 %v822_v15, %v773_v25  ;;  %v882_v10 = vpop.f32.mrf.mxu2 }
 0x106   :  { %v883_v22 = vadd.f32 %v882_v10, %v823_v26 }
 0x108   :  { %v925_v41 = vadd.f32 %v924_v18, %v883_v22 }
 0x109   :  { %v1147_v48 = vpop.f32.mrf.mxu3 }
 0x10a   :  { %v966_v62 = vpop.f32.mrf.mxu0  ;;  %1648 = vxpose.xlu0.b32.end [4/4] (short) %v925_v41, 128 }
 0x10b   :  { %v1048_v58 = vpop.f32.mrf.mxu1  ;;  %v967_v53 = vadd.f32 %v966_v62, %v218_v28 }
 0x10c   :  { %v1100_v33 = vpop.f32.mrf.mxu2  ;;  %v1049_v46 = vadd.f32 %v1048_v58, %v959_v55  ;;  %v219_v58 = vmul.f32 %v3240_v11, %v3204_v21 }
 0x10e   :  { %v1101_v56 = vadd.f32 %v1100_v33, %v1049_v46 }
 0x110   :  { %v1148_v2 = vadd.f32 %v1147_v48, %v1101_v56 }
 0x111   :  { %v1153_v30 = vpop.f32.mrf.mxu3 }
 0x112   :  { %v974_v27 = vpop.f32.mrf.mxu0 }
 0x113   :  { %v1052_v47 = vpop.f32.mrf.mxu1  ;;  %v975_v24 = vadd.f32 %v974_v27, %v3230_v29 }
 0x114   :  { %v1105_v49 = vpop.f32.mrf.mxu2  ;;  %v1053_v42 = vadd.f32 %v1052_v47, %v967_v53  ;;  %v227_v53 = vmul.f32 %v3252_v20, %v3204_v21 }
 0x116   :  { %v1106_v52 = vadd.f32 %v1105_v49, %v1053_v42 }
 0x118   :  { %v1154_v59 = vadd.f32 %v1153_v30, %v1106_v52 }
 0x119   :  { %v1159_v16 = vpop.f32.mrf.mxu3 }
 0x11a   :  { %v982_v63 = vpop.f32.mrf.mxu0 }
 0x11b   :  { %v1056_v4 = vpop.f32.mrf.mxu1  ;;  %v983_v32 = vadd.f32 %v982_v63, %v226_v34 }
 0x11c   :  { %v1110_v50 = vpop.f32.mrf.mxu2  ;;  %v1057_v40 = vadd.f32 %v1056_v4, %v975_v24 }
 0x11e   :  { %v1111_v36 = vadd.f32 %v1110_v50, %v1057_v40 }
 0x120   :  { %v1160_v9 = vadd.f32 %v1159_v16, %v1111_v36 }
 0x121   :  { %v1165_v39 = vpop.f32.mrf.mxu3 }
 0x122   :  { %v1213_v7 = vpop.f32.mrf.mxu0 }
 0x123   :  { %v1060_v17 = vpop.f32.mrf.mxu1  ;;  %v1214_v0 = vadd.f32 %v1213_v7, %v1148_v2 }
 0x124   :  { %v1115_v6 = vpop.f32.mrf.mxu2  ;;  %v1061_v43 = vadd.f32 %v1060_v17, %v983_v32 }
 0x126   :  { %v1116_v61 = vadd.f32 %v1115_v6, %v1061_v43 }
 0x128   :  { %v1166_v25 = vadd.f32 %v1165_v39, %v1116_v61 }
 0x129   :  { %v1391_v23 = vpop.f32.mrf.mxu3 }
 0x12a   :  { %v1217_v60 = vpop.f32.mrf.mxu0 }
 0x12b   :  { %v1255_v45 = vpop.f32.mrf.mxu1  ;;  %v1218_v13 = vadd.f32 %v1217_v60, %v1154_v59 }
 0x12c   :  { %v1256_v3 = vadd.f32 %v1255_v45, %v1214_v0  ;;  %v1301_v51 = vpop.f32.mrf.mxu2 }
 0x12d   :  { %v1302_v10 = vadd.f32 %v1301_v51, %v3217_v1 }
 0x12e   :  { %1677 = vxpose.xlu1.b32.start [1/4] (short) %v1256_v3, 128 }
 0x12f   :  { %v1392_v48 = vadd.f32 %v1391_v23, %v1302_v10 }
 0x131   :  { %v1395_v38 = vpop.f32.mrf.mxu3 }
 0x132   :  { %v1221_v5 = vpop.f32.mrf.mxu0 }
 0x133   :  { %v1259_v57 = vpop.f32.mrf.mxu1  ;;  %v1222_v37 = vadd.f32 %v1221_v5, %v1160_v9 }
 0x134   :  { %v1260_v44 = vadd.f32 %v1259_v57, %v1218_v13  ;;  %v1309_v14 = vpop.f32.mrf.mxu2 }
 0x135   :  { %v1310_v47 = vadd.f32 %v1309_v14, %v219_v58 }
 0x136   :  { %1678 = vxpose.xlu1.b32.cont [2/4] (short) %v1260_v44, 128 }
 0x137   :  { %v1396_v4 = vadd.f32 %v1395_v38, %v1310_v47 }
 0x139   :  { %v1399_v54 = vpop.f32.mrf.mxu3 }
 0x13a   :  { %v1225_v29 = vpop.f32.mrf.mxu0 }
 0x13b   :  { %v1263_v8 = vpop.f32.mrf.mxu1  ;;  %v1226_v15 = vadd.f32 %v1225_v29, %v1166_v25 }
 0x13c   :  { %v1264_v12 = vadd.f32 %v1263_v8, %v1222_v37  ;;  %v1317_v18 = vpop.f32.mrf.mxu2 }
 0x13d   :  { %v1318_v39 = vadd.f32 %v1317_v18, %v3234_v35 }
 0x13e   :  { %1679 = vxpose.xlu1.b32.cont [3/4] (short) %v1264_v12, 128 }
 0x13f   :  { %v1400_v11 = vadd.f32 %v1399_v54, %v1318_v39 }
 0x141   :  { %v1403_v31 = vpop.f32.mrf.mxu3 }
 0x142   :  { %v1443_v26 = vpop.f32.mrf.mxu0 }
 0x143   :  { %v1267_v19 = vpop.f32.mrf.mxu1  ;;  %v1444_v33 = vadd.f32 %v1443_v26, %v1392_v48 }
 0x144   :  { %v1268_v22 = vadd.f32 %v1267_v19, %v1226_v15  ;;  %v1325_v41 = vpop.f32.mrf.mxu2 }
 0x145   :  { %v1326_v0 = vadd.f32 %v1325_v41, %v227_v53 }
 0x146   :  { %1680 = vxpose.xlu1.b32.end [4/4] (short) %v1268_v22, 128 }
 0x147   :  { %v1404_v51 = vadd.f32 %v1403_v31, %v1326_v0 }
 0x149   :  { %v1598_v62 = vpop.f32.mrf.mxu3 }
 0x14a   :  { %v1448_v30 = vpop.f32.mrf.mxu0 }
 0x14b   :  { %v1490_v27 = vpop.f32.mrf.mxu1  ;;  %v1449_v55 = vadd.f32 %v1448_v30, %v1396_v4 }
 0x14c   :  { %v1491_v49 = vadd.f32 %v1490_v27, %v1444_v33  ;;  %v1556_v16 = vpop.f32.mrf.mxu2 }
 0x14e   :  { %v1557_v63 = vadd.f32 %v1556_v16, %v1491_v49 }
 0x150   :  { %v1599_v50 = vadd.f32 %v1598_v62, %v1557_v63 }
 0x152   :  { %1709 = vxpose.xlu2.b32.start [1/4] (short) %v1599_v50, 128  ;;  %v1602_v1 = vpop.f32.mrf.mxu3  ;;  %v1453_v28 = vpop.f32.mrf.mxu0 }
 0x153   :  { %v1496_v46 = vpop.f32.mrf.mxu1  ;;  %v1454_v2 = vadd.f32 %v1453_v28, %v1400_v11 }
 0x154   :  { %v1497_v7 = vadd.f32 %v1496_v46, %v1449_v55  ;;  %v1560_v17 = vpop.f32.mrf.mxu2 }
 0x156   :  { %v1561_v56 = vadd.f32 %v1560_v17, %v1497_v7 }
 0x158   :  { %v1603_v6 = vadd.f32 %v1602_v1, %v1561_v56 }
 0x15a   :  { %1710 = vxpose.xlu2.b32.cont [2/4] (short) %v1603_v6, 128  ;;  %v1606_v23 = vpop.f32.mrf.mxu3  ;;  %v1458_v3 = vpop.f32.mrf.mxu0 }
 0x15b   :  { %v1502_v42 = vpop.f32.mrf.mxu1  ;;  %v1459_v24 = vadd.f32 %v1458_v3, %v1404_v51 }
 0x15c   :  { %v1503_v60 = vadd.f32 %v1502_v42, %v1454_v2  ;;  %v1564_v45 = vpop.f32.mrf.mxu2 }
 0x15e   :  { %v1565_v52 = vadd.f32 %v1564_v45, %v1503_v60 }
 0x160   :  { %v1607_v35 = vadd.f32 %v1606_v23, %v1565_v52 }
 0x162   :  { %1711 = vxpose.xlu2.b32.cont [3/4] (short) %v1607_v35, 128  ;;  %v1610_v13 = vpop.f32.mrf.mxu3 }
 0x163   :  { %v1508_v59 = vpop.f32.mrf.mxu1 }
 0x164   :  { %v1509_v40 = vadd.f32 %v1508_v59, %v1459_v24  ;;  %v1568_v38 = vpop.f32.mrf.mxu2 }
 0x166   :  { %v1569_v5 = vadd.f32 %v1568_v38, %v1509_v40 }
 0x167   :  { %v1629_v21 = vpop.trf.xlu2 }
 0x168   :  { %v1611_v20 = vadd.f32 %v1610_v13, %v1569_v5  ;;  %1742 = vst.msk [vmem:[%s3545_s4] sm:$0xff] %vm1741_vm8, %v1629_v21 }
 0x16a   :  { %1712 = vxpose.xlu2.b32.end [4/4] (short) %v1611_v20, 128 }
 0x16f   :  { %v1630_v57 = vpop.trf.xlu2 }
 0x170   :  { %1743 = vst.msk [vmem:[%s3545_s4 + $0x8] sm:$0xff] %vm1741_vm8, %v1630_v57 }
 0x177   :  { %v1631_v34 = vpop.trf.xlu2 }
 0x178   :  { %1744 = vst.msk [vmem:[%s3545_s4 + $0x10] sm:$0xff] %vm1741_vm8, %v1631_v34 }
 0x17f   :  { %v1632_v36 = vpop.trf.xlu2 }
 0x180   :  { %1745 = vst.msk [vmem:[%s3545_s4 + $0x18] sm:$0xff] %vm1741_vm8, %v1632_v36 }
 0x187   :  { %v1633_v44 = vpop.trf.xlu2 }
 0x188   :  { %1746 = vst.msk [vmem:[%s3545_s4 + $0x20] sm:$0xff] %vm1741_vm8, %v1633_v44 }
 0x18f   :  { %v1634_v14 = vpop.trf.xlu2 }
 0x190   :  { %1747 = vst.msk [vmem:[%s3545_s4 + $0x28] sm:$0xff] %vm1741_vm8, %v1634_v14 }
 0x196   :  { %v1661_v8 = vpop.trf.xlu0 }
 0x197   :  { %v1635_v32 = vpop.trf.xlu2  ;;  %1758 = vst.msk [vmem:[%s3545_s4 + $0x80] sm:$0xff] %vm1741_vm8, %v1661_v8 }
 0x198   :  { %1748 = vst.msk [vmem:[%s3545_s4 + $0x30] sm:$0xff] %vm1741_vm8, %v1635_v32 }
 0x19e   :  { %v1662_v12 = vpop.trf.xlu0 }
 0x19f   :  { %v1636_v9 = vpop.trf.xlu2  ;;  %1759 = vst.msk [vmem:[%s3545_s4 + $0x88] sm:$0xff] %vm1741_vm8, %v1662_v12 }
 0x1a0   :  { %1749 = vst.msk [vmem:[%s3545_s4 + $0x38] sm:$0xff] %vm1741_vm8, %v1636_v9 }
 0x1a6   :  { %v1663_v31 = vpop.trf.xlu0 }
 0x1a7   :  { %v1637_v43 = vpop.trf.xlu2  ;;  %1760 = vst.msk [vmem:[%s3545_s4 + $0x90] sm:$0xff] %vm1741_vm8, %v1663_v31 }
 0x1a8   :  { %1750 = vst.msk [vmem:[%s3545_s4 + $0x40] sm:$0xff] %vm1741_vm8, %v1637_v43 }
 0x1ae   :  { %v1664_v19 = vpop.trf.xlu0 }
 0x1af   :  { %v1638_v54 = vpop.trf.xlu2  ;;  %1761 = vst.msk [vmem:[%s3545_s4 + $0x98] sm:$0xff] %vm1741_vm8, %v1664_v19 }
 0x1b0   :  { %1751 = vst.msk [vmem:[%s3545_s4 + $0x48] sm:$0xff] %vm1741_vm8, %v1638_v54 }
 0x1b6   :  { %v1665_v41 = vpop.trf.xlu0 }
 0x1b7   :  { %v1639_v37 = vpop.trf.xlu2  ;;  %1762 = vst.msk [vmem:[%s3545_s4 + $0xa0] sm:$0xff] %vm1741_vm8, %v1665_v41 }
 0x1b8   :  { %1752 = vst.msk [vmem:[%s3545_s4 + $0x50] sm:$0xff] %vm1741_vm8, %v1639_v37 }
 0x1be   :  { %v1666_v58 = vpop.trf.xlu0 }
 0x1bf   :  { %v1640_v29 = vpop.trf.xlu2  ;;  %1763 = vst.msk [vmem:[%s3545_s4 + $0xa8] sm:$0xff] %vm1741_vm8, %v1666_v58 }
 0x1c0   :  { %1753 = vst.msk [vmem:[%s3545_s4 + $0x58] sm:$0xff] %vm1741_vm8, %v1640_v29 }
 0x1c6   :  { %v1667_v27 = vpop.trf.xlu0 }
 0x1c7   :  { %v1641_v61 = vpop.trf.xlu2  ;;  %1764 = vst.msk [vmem:[%s3545_s4 + $0xb0] sm:$0xff] %vm1741_vm8, %v1667_v27 }
 0x1c8   :  { %1754 = vst.msk [vmem:[%s3545_s4 + $0x60] sm:$0xff] %vm1741_vm8, %v1641_v61 }
 0x1ce   :  { %v1668_v16 = vpop.trf.xlu0 }
 0x1cf   :  { %v1642_v18 = vpop.trf.xlu2  ;;  %1765 = vst.msk [vmem:[%s3545_s4 + $0xb8] sm:$0xff] %vm1741_vm8, %v1668_v16 }
 0x1d0   :  { %1755 = vst.msk [vmem:[%s3545_s4 + $0x68] sm:$0xff] %vm1741_vm8, %v1642_v18 }
 0x1d2   :  { %v1693_v25 = vpop.trf.xlu1 }
 0x1d3   :  { %1774 = vst.msk [vmem:[%s3545_s4 + $0x100] sm:$0xff] %vm1741_vm8, %v1693_v25 }
 0x1d6   :  { %v1669_v50 = vpop.trf.xlu0 }
 0x1d7   :  { %v1643_v15 = vpop.trf.xlu2  ;;  %1766 = vst.msk [vmem:[%s3545_s4 + $0xc0] sm:$0xff] %vm1741_vm8, %v1669_v50 }
 0x1d8   :  { %1756 = vst.msk [vmem:[%s3545_s4 + $0x70] sm:$0xff] %vm1741_vm8, %v1643_v15 }
 0x1da   :  { %v1694_v26 = vpop.trf.xlu1 }
 0x1db   :  { %1775 = vst.msk [vmem:[%s3545_s4 + $0x108] sm:$0xff] %vm1741_vm8, %v1694_v26 }
 0x1de   :  { %v1670_v46 = vpop.trf.xlu0 }
 0x1df   :  { %v1644_v10 = vpop.trf.xlu2  ;;  %1767 = vst.msk [vmem:[%s3545_s4 + $0xc8] sm:$0xff] %vm1741_vm8, %v1670_v46 }
 0x1e0   :  { %1757 = vst.msk [vmem:[%s3545_s4 + $0x78] sm:$0xff] %vm1741_vm8, %v1644_v10 }
 0x1e2   :  { %v1695_v22 = vpop.trf.xlu1 }
 0x1e3   :  { %1776 = vst.msk [vmem:[%s3545_s4 + $0x110] sm:$0xff] %vm1741_vm8, %v1695_v22 }
 0x1e6   :  { %v1671_v17 = vpop.trf.xlu0 }
 0x1e7   :  { %1768 = vst.msk [vmem:[%s3545_s4 + $0xd0] sm:$0xff] %vm1741_vm8, %v1671_v17 }
 0x1ea   :  { %v1696_v48 = vpop.trf.xlu1 }
 0x1eb   :  { %v1725_v62 = vpop.trf.xlu2  ;;  %1777 = vst.msk [vmem:[%s3545_s4 + $0x118] sm:$0xff] %vm1741_vm8, %v1696_v48 }
 0x1ec   :  { %1790 = vst.msk [vmem:[%s3545_s4 + $0x180] sm:$0xff] %vm1741_vm8, %v1725_v62 }
 0x1ee   :  { %v1672_v11 = vpop.trf.xlu0 }
 0x1ef   :  { %1769 = vst.msk [vmem:[%s3545_s4 + $0xd8] sm:$0xff] %vm1741_vm8, %v1672_v11 }
 0x1f2   :  { %v1697_v33 = vpop.trf.xlu1 }
 0x1f3   :  { %v1726_v30 = vpop.trf.xlu2  ;;  %1778 = vst.msk [vmem:[%s3545_s4 + $0x120] sm:$0xff] %vm1741_vm8, %v1697_v33 }
 0x1f4   :  { %1791 = vst.msk [vmem:[%s3545_s4 + $0x188] sm:$0xff] %vm1741_vm8, %v1726_v30 }
 0x1f6   :  { %v1673_v2 = vpop.trf.xlu0 }
 0x1f7   :  { %1770 = vst.msk [vmem:[%s3545_s4 + $0xe0] sm:$0xff] %vm1741_vm8, %v1673_v2 }
 0x1fa   :  { %v1698_v47 = vpop.trf.xlu1 }
 0x1fb   :  { %v1727_v49 = vpop.trf.xlu2  ;;  %1779 = vst.msk [vmem:[%s3545_s4 + $0x128] sm:$0xff] %vm1741_vm8, %v1698_v47 }
 0x1fc   :  { %1792 = vst.msk [vmem:[%s3545_s4 + $0x190] sm:$0xff] %vm1741_vm8, %v1727_v49 }
 0x1fe   :  { %v1674_v0 = vpop.trf.xlu0 }
 0x1ff   :  { %1771 = vst.msk [vmem:[%s3545_s4 + $0xe8] sm:$0xff] %vm1741_vm8, %v1674_v0 }
 0x202   :  { %v1699_v63 = vpop.trf.xlu1 }
 0x203   :  { %v1728_v4 = vpop.trf.xlu2  ;;  %1780 = vst.msk [vmem:[%s3545_s4 + $0x130] sm:$0xff] %vm1741_vm8, %v1699_v63 }
 0x204   :  { %1793 = vst.msk [vmem:[%s3545_s4 + $0x198] sm:$0xff] %vm1741_vm8, %v1728_v4 }
 0x206   :  { %v1675_v52 = vpop.trf.xlu0 }
 0x207   :  { %1772 = vst.msk [vmem:[%s3545_s4 + $0xf0] sm:$0xff] %vm1741_vm8, %v1675_v52 }
 0x20a   :  { %v1700_v55 = vpop.trf.xlu1 }
 0x20b   :  { %v1729_v1 = vpop.trf.xlu2  ;;  %1781 = vst.msk [vmem:[%s3545_s4 + $0x138] sm:$0xff] %vm1741_vm8, %v1700_v55 }
 0x20c   :  { %1794 = vst.msk [vmem:[%s3545_s4 + $0x1a0] sm:$0xff] %vm1741_vm8, %v1729_v1 }
 0x20e   :  { %v1676_v35 = vpop.trf.xlu0 }
 0x20f   :  { %1773 = vst.msk [vmem:[%s3545_s4 + $0xf8] sm:$0xff] %vm1741_vm8, %v1676_v35 }
 0x212   :  { %v1701_v39 = vpop.trf.xlu1 }
 0x213   :  { %v1730_v7 = vpop.trf.xlu2  ;;  %1782 = vst.msk [vmem:[%s3545_s4 + $0x140] sm:$0xff] %vm1741_vm8, %v1701_v39 }
 0x214   :  { %1795 = vst.msk [vmem:[%s3545_s4 + $0x1a8] sm:$0xff] %vm1741_vm8, %v1730_v7 }
 0x21a   :  { %v1702_v28 = vpop.trf.xlu1 }
 0x21b   :  { %v1731_v56 = vpop.trf.xlu2  ;;  %1783 = vst.msk [vmem:[%s3545_s4 + $0x148] sm:$0xff] %vm1741_vm8, %v1702_v28 }
 0x21c   :  { %1796 = vst.msk [vmem:[%s3545_s4 + $0x1b0] sm:$0xff] %vm1741_vm8, %v1731_v56 }
 0x222   :  { %v1703_v6 = vpop.trf.xlu1 }
 0x223   :  { %v1732_v53 = vpop.trf.xlu2  ;;  %1784 = vst.msk [vmem:[%s3545_s4 + $0x150] sm:$0xff] %vm1741_vm8, %v1703_v6 }
 0x224   :  { %1797 = vst.msk [vmem:[%s3545_s4 + $0x1b8] sm:$0xff] %vm1741_vm8, %v1732_v53 }
 0x22a   :  { %v1704_v42 = vpop.trf.xlu1 }
 0x22b   :  { %v1733_v23 = vpop.trf.xlu2  ;;  %1785 = vst.msk [vmem:[%s3545_s4 + $0x158] sm:$0xff] %vm1741_vm8, %v1704_v42 }
 0x22c   :  { %1798 = vst.msk [vmem:[%s3545_s4 + $0x1c0] sm:$0xff] %vm1741_vm8, %v1733_v23 }
 0x232   :  { %v1705_v60 = vpop.trf.xlu1 }
 0x233   :  { %v1734_v45 = vpop.trf.xlu2  ;;  %1786 = vst.msk [vmem:[%s3545_s4 + $0x160] sm:$0xff] %vm1741_vm8, %v1705_v60 }
 0x234   :  { %1799 = vst.msk [vmem:[%s3545_s4 + $0x1c8] sm:$0xff] %vm1741_vm8, %v1734_v45 }
 0x23a   :  { %v1706_v3 = vpop.trf.xlu1 }
 0x23b   :  { %v1735_v51 = vpop.trf.xlu2  ;;  %1787 = vst.msk [vmem:[%s3545_s4 + $0x168] sm:$0xff] %vm1741_vm8, %v1706_v3 }
 0x23c   :  { %1800 = vst.msk [vmem:[%s3545_s4 + $0x1d0] sm:$0xff] %vm1741_vm8, %v1735_v51 }
 0x242   :  { %v1707_v24 = vpop.trf.xlu1 }
 0x243   :  { %v1736_v59 = vpop.trf.xlu2  ;;  %1788 = vst.msk [vmem:[%s3545_s4 + $0x170] sm:$0xff] %vm1741_vm8, %v1707_v24 }
 0x244   :  { %1801 = vst.msk [vmem:[%s3545_s4 + $0x1d8] sm:$0xff] %vm1741_vm8, %v1736_v59 }
 0x24a   :  { %v1708_v40 = vpop.trf.xlu1 }
 0x24b   :  { %v1737_v38 = vpop.trf.xlu2  ;;  %1789 = vst.msk [vmem:[%s3545_s4 + $0x178] sm:$0xff] %vm1741_vm8, %v1708_v40 }
 0x24c   :  { %1802 = vst.msk [vmem:[%s3545_s4 + $0x1e0] sm:$0xff] %vm1741_vm8, %v1737_v38 }
 0x253   :  { %v1738_v13 = vpop.trf.xlu2 }
 0x254   :  { %1803 = vst.msk [vmem:[%s3545_s4 + $0x1e8] sm:$0xff] %vm1741_vm8, %v1738_v13 }
 0x25b   :  { %v1739_v5 = vpop.trf.xlu2 }
 0x25c   :  { %1804 = vst.msk [vmem:[%s3545_s4 + $0x1f0] sm:$0xff] %vm1741_vm8, %v1739_v5 }
 0x263   :  { %v1740_v21 = vpop.trf.xlu2 }
 0x264   :  { %1805 = vst.msk [vmem:[%s3545_s4 + $0x1f8] sm:$0xff] %vm1741_vm8, %v1740_v21 }
 0x265   :  { %1810 = vsyncpa [#allocation3], 1 }
 0x266   :  { %1811 = vsyncpa [#allocation5], 1 }

</bundles_post_ra>
